<compile_context>
chip_gen: v7x
topology: tpu7x:2x2x1
jax: 0.10.0
libtpu: 0.0.40
codegen_flags: <defaults>
</compile_context>

<pallas_src>
import numpy as np
import jax
import jax.numpy as jnp
from jax.experimental import pallas as pl
from jax.experimental.pallas import tpu as pltpu

N_LATENT = 2
L_IN = 40          # input signal length implied by enc4 in_features = 12*6 + 1
LANES = 128
N_LAYERS = 12      # 3 conv + enc4/enc5 + fused heads + dec1..3 + 3 convT
PERIOD_LANE = L_IN  # lane 40 of the packed input row carries `period`


# ---------------------------------------------------------------------------
# Conv1d / ConvTranspose1d -> dense (in_flat, out_flat) matrices
# (channel-major flattening on both sides, matching torch .view(-1, C*L)).
# ---------------------------------------------------------------------------
def _conv1d_dense(w, b, L_in, stride, pad):
    C_out, C_in, K = w.shape
    L_out = (L_in + 2 * pad - K) // stride + 1
    M = np.zeros((C_in * L_in, C_out * L_out), np.float32)
    for co in range(C_out):
        for t in range(L_out):
            for ci in range(C_in):
                for j in range(K):
                    i = stride * t + j - pad
                    if 0 <= i < L_in:
                        M[ci * L_in + i, co * L_out + t] += w[co, ci, j]
    return M, np.repeat(np.asarray(b, np.float32), L_out), L_out


def _convT1d_dense(w, b, L_in, stride, pad):
    C_in, C_out, K = w.shape
    L_out = (L_in - 1) * stride - 2 * pad + K
    M = np.zeros((C_in * L_in, C_out * L_out), np.float32)
    for ci in range(C_in):
        for i in range(L_in):
            for co in range(C_out):
                for j in range(K):
                    t = stride * i + j - pad
                    if 0 <= t < L_out:
                        M[ci * L_in + i, co * L_out + t] += w[ci, co, j]
    return M, np.repeat(np.asarray(b, np.float32), L_out), L_out


# ---------------------------------------------------------------------------
# Pallas kernel: full forward (encode -> sample -> decode), one grid step.
# ---------------------------------------------------------------------------
def _make_vae_kernel(B, k, R):
    def kernel(x_ref, e_ref, w_ref, ml_ref, dec_ref):
        biases = w_ref[N_LAYERS]                       # (128,128): row i = bias of layer i

        def layer(h, i, act=True):
            o = jnp.dot(h, w_ref[i], preferred_element_type=jnp.float32)
            o = o + biases[i:i + 1, :]                 # (1,128) broadcast over rows
            return jnp.maximum(o, 0.0) if act else o

        # ---- encoder: conv stack (dense) + MLP; period rides along in dedicated lanes ----
        h = x_ref[...]                                 # (R,128): x @ lanes 0..39, period @ 40
        h = layer(h, 0)                                # conv1 -> 60 lanes (+p,-p carried)
        h = layer(h, 1)                                # conv2 -> 72 lanes (+ carry)
        h = layer(h, 2)                                # conv3 -> 72 lanes (+ carry)
        h = layer(h, 3)                                # enc4  -> 128 (period folded into rows)
        h = layer(h, 4)                                # enc5  -> 64
        ml = layer(h, 5, act=False)                    # fused heads: lanes 0,1=logstd 2,3=mu
        ml_ref[...] = ml                               # single lane-dense stats output

        # ---- reparameterisation (no one-hot matmul) ----
        if k > 1:                                      # sample-major replication of per-batch stats
            pieces = [ml[:B, :]] * k
            if R > B * k:
                pieces.append(jnp.zeros((R - B * k, LANES), jnp.float32))
            ml_rep = jnp.concatenate(pieces, axis=0)
        else:
            ml_rep = ml
        lane = jax.lax.broadcasted_iota(jnp.int32, (R, LANES), 1)
        # z: lanes 0,1 = e * exp(0.5*logstd), lanes 2,3 = mu, rest 0.  dec1's packed weight
        # duplicates its two rows at rows 2,3 so one matmul computes (e*std + mu) @ Wd1.
        z = e_ref[...] * jnp.exp(0.5 * ml_rep) + jnp.where(lane >= N_LATENT, ml_rep, 0.0)

        # ---- decoder: MLP + ConvTranspose stack (dense) ----
        g = layer(z, 6)                                # dec1 -> 64
        g = layer(g, 7)                                # dec2 -> 128
        g = layer(g, 8)                                # dec3 (truncated to 72 outputs)
        g = layer(g, 9)                                # dec6 -> 72
        g = layer(g, 10)                               # dec5 -> 60
        dec_ref[...] = layer(g, 11, act=False)         # dec4 -> lanes 0..39 real, lane-dense store
    return kernel


# ---------------------------------------------------------------------------
# Wrapper
# ---------------------------------------------------------------------------
def vae_forward(x, k, period, slab, e):
    """Returns (enc_mu, enc_logstd, decoded) matching VAE.forward(x, k, period),
    with the gaussian noise `e` supplied externally for determinism."""
    B = x.shape[0]
    k = int(k)
    R = max(8, ((B * k + 7) // 8) * 8)                 # pad rows to >= 8 (full sublane tile)

    x_full = jnp.zeros((R, LANES), jnp.float32)
    x_full = x_full.at[:B, :L_IN].set(x.astype(jnp.float32))
    x_full = x_full.at[:B, PERIOD_LANE].set(period.astype(jnp.float32))

    # noise rows are sample-major inside the kernel (row = s*B + b)
    e_sm = jnp.transpose(e.astype(jnp.float32).reshape(B, k, N_LATENT), (1, 0, 2))
    e_sm = e_sm.reshape(B * k, N_LATENT)
    e_full = jnp.zeros((R, LANES), jnp.float32).at[:B * k, :N_LATENT].set(e_sm)

    kernel = _make_vae_kernel(B, k, R)
    ml_out, dec_out = pl.pallas_call(
        kernel,
        out_shape=(jax.ShapeDtypeStruct((R, LANES), jnp.float32),
                   jax.ShapeDtypeStruct((R, LANES), jnp.float32)),
        grid=(1,),
        in_specs=[
            pl.BlockSpec((R, LANES), lambda i: (0, 0)),
            pl.BlockSpec((R, LANES), lambda i: (0, 0)),
            pl.BlockSpec((N_LAYERS + 1, LANES, LANES), lambda i: (0, 0, 0)),
        ],
        out_specs=(
            pl.BlockSpec((R, LANES), lambda i: (0, 0)),
            pl.BlockSpec((R, LANES), lambda i: (0, 0)),
        ),
        compiler_params=pltpu.CompilerParams(dimension_semantics=("arbitrary",)),
    )(x_full, e_full, slab)

    logstd = ml_out[:B, 0:N_LATENT]
    mu = ml_out[:B, N_LATENT:2 * N_LATENT]
    dec = dec_out[:B * k, :L_IN]
    dec = dec.reshape(k, B, L_IN).transpose(1, 0, 2).reshape(B * k, L_IN)  # -> torch (b, k) row order
    return mu, logstd, dec


# ---------------------------------------------------------------------------
# Deterministic parameter construction (PyTorch-style uniform(-1/sqrt(fan_in), .))
# ---------------------------------------------------------------------------
def build_raw_params(key):
    ks = jax.random.split(key, 26)

    def u(kk, shape, fan_in):
        bnd = 1.0 / np.sqrt(fan_in)
        return np.asarray(jax.random.uniform(kk, shape, jnp.float32, -bnd, bnd))

    p = {}
    p["w_e1"], p["b_e1"] = u(ks[0], (3, 1, 4), 4), u(ks[1], (3,), 4)
    p["w_e2"], p["b_e2"] = u(ks[2], (6, 3, 4), 12), u(ks[3], (6,), 12)
    p["w_e3"], p["b_e3"] = u(ks[4], (12, 6, 4), 24), u(ks[5], (12,), 24)
    p["w4"],   p["b4"]   = u(ks[6], (128, 73), 73), u(ks[7], (128,), 73)
    p["w5"],   p["b5"]   = u(ks[8], (64, 128), 128), u(ks[9], (64,), 128)
    p["wmu"],  p["bmu"]  = u(ks[10], (2, 64), 64), u(ks[11], (2,), 64)
    p["wls"],  p["bls"]  = u(ks[12], (2, 64), 64), u(ks[13], (2,), 64)
    p["wd1"],  p["bd1"]  = u(ks[14], (64, 2), 2), u(ks[15], (64,), 2)
    p["wd2"],  p["bd2"]  = u(ks[16], (128, 64), 64), u(ks[17], (128,), 64)
    p["wd3"],  p["bd3"]  = u(ks[18], (73, 128), 128), u(ks[19], (73,), 128)
    p["w_d4"], p["bT4"]  = u(ks[20], (3, 1, 4), 4), u(ks[21], (1,), 4)
    p["w_d5"], p["bT5"]  = u(ks[22], (6, 3, 4), 12), u(ks[23], (3,), 12)
    p["w_d6"], p["bT6"]  = u(ks[24], (12, 6, 4), 24), u(ks[25], (6,), 24)
    return p


def pack_slab(p):
    """Pack all layers into one (13, 128, 128) slab: pages 0..11 weights, page 12 bias rows."""
    slab = np.zeros((N_LAYERS + 1, LANES, LANES), np.float32)

    def put(i, W, b):
        W = np.asarray(W, np.float32)
        b = np.asarray(b, np.float32)
        slab[i, :W.shape[0], :W.shape[1]] = W
        slab[N_LAYERS, i, :b.shape[0]] = b

    m1, b1f, L1 = _conv1d_dense(p["w_e1"], p["b_e1"], L_IN, 2, 1)   # 40 -> (3,20)
    m2, b2f, L2 = _conv1d_dense(p["w_e2"], p["b_e2"], L1, 2, 3)     # 20 -> (6,12)
    m3, b3f, L3 = _conv1d_dense(p["w_e3"], p["b_e3"], L2, 2, 1)     # 12 -> (12,6)
    assert 12 * L3 + 1 == 73

    d6, db6, Ld6 = _convT1d_dense(p["w_d6"], p["bT6"], 6, 2, 1)     # (12,6) -> (6,12)
    d5, db5, Ld5 = _convT1d_dense(p["w_d5"], p["bT5"], Ld6, 2, 3)   # (6,12) -> (3,20)
    d4, db4, Ld4 = _convT1d_dense(p["w_d4"], p["bT4"], Ld5, 2, 1)   # (3,20) -> (1,40)
    assert Ld4 == L_IN

    # encoder conv stack; `period` rides along as a (+p,-p) lane pair so ReLU can't clip it
    # (enc4 reconstructs p = relu(p) - relu(-p) via signed weight rows).
    put(0, m1, b1f)
    slab[0, PERIOD_LANE, 3 * L1 + 0] = 1.0
    slab[0, PERIOD_LANE, 3 * L1 + 1] = -1.0
    put(1, m2, b2f)
    slab[1, 3 * L1 + 0, 6 * L2 + 0] = 1.0
    slab[1, 3 * L1 + 1, 6 * L2 + 1] = 1.0
    put(2, m3, b3f)
    slab[2, 6 * L2 + 0, 12 * L3 + 0] = 1.0
    slab[2, 6 * L2 + 1, 12 * L3 + 1] = 1.0

    # enc4: conv features at rows 0..71, period pair at rows 72/73
    W3 = np.zeros((74, 128), np.float32)
    W3[:72] = p["w4"][:, :72].T
    W3[72] = p["w4"][:, 72]
    W3[73] = -p["w4"][:, 72]
    put(3, W3, p["b4"])
    put(4, p["w5"].T, p["b5"])

    # fused heads: output lanes 0,1 = logstd ; lanes 2,3 = mu
    Wh = np.zeros((64, 4), np.float32)
    Wh[:, 0:2] = p["wls"].T
    Wh[:, 2:4] = p["wmu"].T
    put(5, Wh, np.concatenate([p["bls"], p["bmu"]]))

    # dec1: rows 0,1 act on e*std, rows 2,3 (duplicate) act on mu -> one matmul == z @ Wd1
    W6 = np.zeros((4, 64), np.float32)
    W6[0:2] = p["wd1"].T
    W6[2:4] = p["wd1"].T
    put(6, W6, p["bd1"])
    put(7, p["wd2"].T, p["bd2"])
    put(8, p["wd3"][:72, :].T, p["bd3"][:72])   # dec3 truncated to its first 72 outputs
    put(9, d6, db6)
    put(10, d5, db5)
    put(11, d4, db4)
    return slab


# ---------------------------------------------------------------------------
# Pure-numpy reference faithful to the PyTorch module (direct conv / convT)
# ---------------------------------------------------------------------------
def _np_conv1d(x, w, b, stride, pad):
    Bn, C_in, L = x.shape
    C_out, _, K = w.shape
    L_out = (L + 2 * pad - K) // stride + 1
    xp = np.zeros((Bn, C_in, L + 2 * pad), np.float32)
    xp[:, :, pad:pad + L] = x
    out = np.zeros((Bn, C_out, L_out), np.float32)
    for t in range(L_out):
        seg = xp[:, :, t * stride:t * stride + K]
        out[:, :, t] = np.tensordot(seg, w, axes=([1, 2], [1, 2])) + b
    return out


def _np_convT1d(x, w, b, stride, pad):
    Bn, C_in, L = x.shape
    _, C_out, K = w.shape
    L_out = (L - 1) * stride - 2 * pad + K
    full = np.zeros((Bn, C_out, (L - 1) * stride + K), np.float32)
    for i in range(L):
        full[:, :, i * stride:i * stride + K] += np.tensordot(x[:, :, i], w, axes=([1], [0]))
    return full[:, :, pad:pad + L_out] + b[None, :, None]


def ref_forward(x, period, e, k, p):
    relu = lambda t: np.maximum(t, 0.0)
    x = np.asarray(x, np.float32)
    B = x.shape[0]
    h = relu(_np_conv1d(x.reshape(B, 1, L_IN), p["w_e1"], p["b_e1"], 2, 1))
    h = relu(_np_conv1d(h, p["w_e2"], p["b_e2"], 2, 3))
    h = relu(_np_conv1d(h, p["w_e3"], p["b_e3"], 2, 1))
    h = h.reshape(B, -1)
    h = np.concatenate([h, np.asarray(period, np.float32).reshape(B, 1)], axis=1)
    h = relu(h @ p["w4"].T + p["b4"])
    h = relu(h @ p["w5"].T + p["b5"])
    mu = h @ p["wmu"].T + p["bmu"]
    logstd = h @ p["wls"].T + p["bls"]
    std = np.exp(0.5 * logstd)
    e3 = np.asarray(e, np.float32).reshape(B, k, N_LATENT)
    z = e3 * std[:, None, :] + mu[:, None, :]
    g = relu(z @ p["wd1"].T + p["bd1"])
    g = relu(g @ p["wd2"].T + p["bd2"])
    g = relu(g @ p["wd3"].T + p["bd3"])[:, :, :72]
    g = g.reshape(B * k, 12, 6)
    g = relu(_np_convT1d(g, p["w_d6"], p["bT6"], 2, 1))
    g = relu(_np_convT1d(g, p["w_d5"], p["bT5"], 2, 3))
    dec = _np_convT1d(g, p["w_d4"], p["bT4"], 2, 1).reshape(B * k, L_IN)
    return mu, logstd, dec


if __name__ == "__main__":
    key = jax.random.PRNGKey(0)
    kx, kp, ke, kw = jax.random.split(key, 4)
    B, k = 2, 1
    x = jax.random.normal(kx, (B, L_IN), jnp.float32)
    period = jax.random.uniform(kp, (B,), jnp.float32, 0.5, 2.0)
    e = jax.random.normal(ke, (B, k, N_LATENT), jnp.float32)   # torch.randn equivalent for sample()

    raw = build_raw_params(kw)
    slab = jnp.asarray(pack_slab(raw))

    mu, logstd, dec = vae_forward(x, k, period, slab, e)
    jax.block_until_ready((mu, logstd, dec))

    mu_r, ls_r, dec_r = ref_forward(np.asarray(x), np.asarray(period), np.asarray(e), k, raw)
    assert mu.shape == (B, N_LATENT) and logstd.shape == (B, N_LATENT) and dec.shape == (B * k, L_IN)
    # DEFAULT MXU precision (bf16 passes) vs f32 numpy reference -> 2e-2 tolerance.
    assert np.allclose(np.asarray(mu), mu_r, atol=2e-2, rtol=2e-2)
    assert np.allclose(np.asarray(logstd), ls_r, atol=2e-2, rtol=2e-2)
    assert np.allclose(np.asarray(dec), dec_r, atol=2e-2, rtol=2e-2)
    print("KERNEL_OK")
</pallas_src>

<mosaic_0001>
module attributes {stable_mosaic.version = 11 : i64} {
  func.func @kernel(%arg0: i32, %arg1: memref<8x128xf32, #tpu.memory_space<vmem>>, %arg2: memref<8x128xf32, #tpu.memory_space<vmem>>, %arg3: memref<13x128x128xf32, #tpu.memory_space<vmem>>, %arg4: memref<8x128xf32, #tpu.memory_space<vmem>>, %arg5: memref<8x128xf32, #tpu.memory_space<vmem>>) attributes {dimension_semantics = [#tpu.dimension_semantics<arbitrary>], iteration_bounds = array<i64: 1>, scalar_prefetch = 0 : i64, scratch_operands = 0 : i64, tpu.core_type = #tpu.core_type<tc>, window_params = [{pipeline_mode = #tpu.pipeline_mode<synchronous>, transform_indices = @transform_0, window_bounds = array<i64: 8, 128>}, {pipeline_mode = #tpu.pipeline_mode<synchronous>, transform_indices = @transform_1, window_bounds = array<i64: 8, 128>}, {pipeline_mode = #tpu.pipeline_mode<synchronous>, transform_indices = @transform_2, window_bounds = array<i64: 13, 128, 128>}, {pipeline_mode = #tpu.pipeline_mode<synchronous>, transform_indices = @transform_3, window_bounds = array<i64: 8, 128>}, {pipeline_mode = #tpu.pipeline_mode<synchronous>, transform_indices = @transform_4, window_bounds = array<i64: 8, 128>}]} {
    %c12 = arith.constant 12 : index
    %c0 = arith.constant 0 : index
    %c0_0 = arith.constant 0 : index
    %0 = vector.load %arg3[%c12, %c0, %c0_0] : memref<13x128x128xf32, #tpu.memory_space<vmem>>, vector<1x128x128xf32>
    %1 = vector.shape_cast %0 : vector<1x128x128xf32> to vector<128x128xf32>
    %c0_1 = arith.constant 0 : index
    %c0_2 = arith.constant 0 : index
    %2 = vector.load %arg1[%c0_1, %c0_2] : memref<8x128xf32, #tpu.memory_space<vmem>>, vector<8x128xf32>
    %c0_3 = arith.constant 0 : index
    %c0_4 = arith.constant 0 : index
    %c0_5 = arith.constant 0 : index
    %3 = vector.load %arg3[%c0_3, %c0_4, %c0_5] : memref<13x128x128xf32, #tpu.memory_space<vmem>>, vector<1x128x128xf32>
    %4 = vector.shape_cast %3 : vector<1x128x128xf32> to vector<128x128xf32>
    %cst = arith.constant dense<0.000000e+00> : vector<8x128xf32>
    %5 = tpu.matmul %2, %4, %cst {dimension_numbers = #tpu.dot_dimension_numbers<[1], [0], [0], [1], [0, 0, 1, 1], [], []>} : vector<8x128xf32>, vector<128x128xf32>, vector<8x128xf32> -> vector<8x128xf32>
    %6 = vector.extract_strided_slice %1 {offsets = [0, 0], sizes = [1, 128], strides = [1, 1]} : vector<128x128xf32> to vector<1x128xf32>
    %7 = vector.broadcast %6 : vector<1x128xf32> to vector<8x128xf32>
    %8 = arith.addf %5, %7 : vector<8x128xf32>
    %cst_6 = arith.constant 0.000000e+00 : f32
    %9 = vector.broadcast %cst_6 : f32 to vector<8x128xf32>
    %10 = arith.maximumf %8, %9 : vector<8x128xf32>
    %c1 = arith.constant 1 : index
    %c0_7 = arith.constant 0 : index
    %c0_8 = arith.constant 0 : index
    %11 = vector.load %arg3[%c1, %c0_7, %c0_8] : memref<13x128x128xf32, #tpu.memory_space<vmem>>, vector<1x128x128xf32>
    %12 = vector.shape_cast %11 : vector<1x128x128xf32> to vector<128x128xf32>
    %cst_9 = arith.constant dense<0.000000e+00> : vector<8x128xf32>
    %13 = tpu.matmul %10, %12, %cst_9 {dimension_numbers = #tpu.dot_dimension_numbers<[1], [0], [0], [1], [0, 0, 1, 1], [], []>} : vector<8x128xf32>, vector<128x128xf32>, vector<8x128xf32> -> vector<8x128xf32>
    %14 = vector.extract_strided_slice %1 {offsets = [1, 0], sizes = [1, 128], strides = [1, 1]} : vector<128x128xf32> to vector<1x128xf32>
    %15 = vector.broadcast %14 : vector<1x128xf32> to vector<8x128xf32>
    %16 = arith.addf %13, %15 : vector<8x128xf32>
    %cst_10 = arith.constant 0.000000e+00 : f32
    %17 = vector.broadcast %cst_10 : f32 to vector<8x128xf32>
    %18 = arith.maximumf %16, %17 : vector<8x128xf32>
    %c2 = arith.constant 2 : index
    %c0_11 = arith.constant 0 : index
    %c0_12 = arith.constant 0 : index
    %19 = vector.load %arg3[%c2, %c0_11, %c0_12] : memref<13x128x128xf32, #tpu.memory_space<vmem>>, vector<1x128x128xf32>
    %20 = vector.shape_cast %19 : vector<1x128x128xf32> to vector<128x128xf32>
    %cst_13 = arith.constant dense<0.000000e+00> : vector<8x128xf32>
    %21 = tpu.matmul %18, %20, %cst_13 {dimension_numbers = #tpu.dot_dimension_numbers<[1], [0], [0], [1], [0, 0, 1, 1], [], []>} : vector<8x128xf32>, vector<128x128xf32>, vector<8x128xf32> -> vector<8x128xf32>
    %22 = vector.extract_strided_slice %1 {offsets = [2, 0], sizes = [1, 128], strides = [1, 1]} : vector<128x128xf32> to vector<1x128xf32>
    %23 = vector.broadcast %22 : vector<1x128xf32> to vector<8x128xf32>
    %24 = arith.addf %21, %23 : vector<8x128xf32>
    %cst_14 = arith.constant 0.000000e+00 : f32
    %25 = vector.broadcast %cst_14 : f32 to vector<8x128xf32>
    %26 = arith.maximumf %24, %25 : vector<8x128xf32>
    %c3 = arith.constant 3 : index
    %c0_15 = arith.constant 0 : index
    %c0_16 = arith.constant 0 : index
    %27 = vector.load %arg3[%c3, %c0_15, %c0_16] : memref<13x128x128xf32, #tpu.memory_space<vmem>>, vector<1x128x128xf32>
    %28 = vector.shape_cast %27 : vector<1x128x128xf32> to vector<128x128xf32>
    %cst_17 = arith.constant dense<0.000000e+00> : vector<8x128xf32>
    %29 = tpu.matmul %26, %28, %cst_17 {dimension_numbers = #tpu.dot_dimension_numbers<[1], [0], [0], [1], [0, 0, 1, 1], [], []>} : vector<8x128xf32>, vector<128x128xf32>, vector<8x128xf32> -> vector<8x128xf32>
    %30 = vector.extract_strided_slice %1 {offsets = [3, 0], sizes = [1, 128], strides = [1, 1]} : vector<128x128xf32> to vector<1x128xf32>
    %31 = vector.broadcast %30 : vector<1x128xf32> to vector<8x128xf32>
    %32 = arith.addf %29, %31 : vector<8x128xf32>
    %cst_18 = arith.constant 0.000000e+00 : f32
    %33 = vector.broadcast %cst_18 : f32 to vector<8x128xf32>
    %34 = arith.maximumf %32, %33 : vector<8x128xf32>
    %c4 = arith.constant 4 : index
    %c0_19 = arith.constant 0 : index
    %c0_20 = arith.constant 0 : index
    %35 = vector.load %arg3[%c4, %c0_19, %c0_20] : memref<13x128x128xf32, #tpu.memory_space<vmem>>, vector<1x128x128xf32>
    %36 = vector.shape_cast %35 : vector<1x128x128xf32> to vector<128x128xf32>
    %cst_21 = arith.constant dense<0.000000e+00> : vector<8x128xf32>
    %37 = tpu.matmul %34, %36, %cst_21 {dimension_numbers = #tpu.dot_dimension_numbers<[1], [0], [0], [1], [0, 0, 1, 1], [], []>} : vector<8x128xf32>, vector<128x128xf32>, vector<8x128xf32> -> vector<8x128xf32>
    %38 = vector.extract_strided_slice %1 {offsets = [4, 0], sizes = [1, 128], strides = [1, 1]} : vector<128x128xf32> to vector<1x128xf32>
    %39 = vector.broadcast %38 : vector<1x128xf32> to vector<8x128xf32>
    %40 = arith.addf %37, %39 : vector<8x128xf32>
    %cst_22 = arith.constant 0.000000e+00 : f32
    %41 = vector.broadcast %cst_22 : f32 to vector<8x128xf32>
    %42 = arith.maximumf %40, %41 : vector<8x128xf32>
    %c5 = arith.constant 5 : index
    %c0_23 = arith.constant 0 : index
    %c0_24 = arith.constant 0 : index
    %43 = vector.load %arg3[%c5, %c0_23, %c0_24] : memref<13x128x128xf32, #tpu.memory_space<vmem>>, vector<1x128x128xf32>
    %44 = vector.shape_cast %43 : vector<1x128x128xf32> to vector<128x128xf32>
    %cst_25 = arith.constant dense<0.000000e+00> : vector<8x128xf32>
    %45 = tpu.matmul %42, %44, %cst_25 {dimension_numbers = #tpu.dot_dimension_numbers<[1], [0], [0], [1], [0, 0, 1, 1], [], []>} : vector<8x128xf32>, vector<128x128xf32>, vector<8x128xf32> -> vector<8x128xf32>
    %46 = vector.extract_strided_slice %1 {offsets = [5, 0], sizes = [1, 128], strides = [1, 1]} : vector<128x128xf32> to vector<1x128xf32>
    %47 = vector.broadcast %46 : vector<1x128xf32> to vector<8x128xf32>
    %48 = arith.addf %45, %47 : vector<8x128xf32>
    %c0_26 = arith.constant 0 : index
    %c0_27 = arith.constant 0 : index
    %49 = vector.load %arg4[%c0_26, %c0_27] : memref<8x128xf32, #tpu.memory_space<vmem>>, vector<8x128xf32>
    tpu.vector_store %arg4[%c0_26, %c0_27], %48 {strides = array<i32>} : memref<8x128xf32, #tpu.memory_space<vmem>>, vector<8x128xf32>,
    %50 = tpu.iota {dimensions = array<i32: 1>} : vector<8x128xi32>
    %c0_28 = arith.constant 0 : index
    %c0_29 = arith.constant 0 : index
    %51 = vector.load %arg2[%c0_28, %c0_29] : memref<8x128xf32, #tpu.memory_space<vmem>>, vector<8x128xf32>
    %cst_30 = arith.constant 5.000000e-01 : f32
    %52 = vector.broadcast %cst_30 : f32 to vector<8x128xf32>
    %53 = arith.mulf %52, %48 : vector<8x128xf32>
    %54 = math.exp %53 : vector<8x128xf32>
    %55 = arith.mulf %51, %54 : vector<8x128xf32>
    %c2_i32 = arith.constant 2 : i32
    %56 = vector.broadcast %c2_i32 : i32 to vector<8x128xi32>
    %57 = arith.cmpi sge, %50, %56 : vector<8x128xi32>
    %cst_31 = arith.constant 0.000000e+00 : f32
    %58 = vector.broadcast %cst_31 : f32 to vector<8x128xf32>
    %59 = arith.select %57, %48, %58 : vector<8x128xi1>, vector<8x128xf32>
    %60 = arith.addf %55, %59 : vector<8x128xf32>
    %c6 = arith.constant 6 : index
    %c0_32 = arith.constant 0 : index
    %c0_33 = arith.constant 0 : index
    %61 = vector.load %arg3[%c6, %c0_32, %c0_33] : memref<13x128x128xf32, #tpu.memory_space<vmem>>, vector<1x128x128xf32>
    %62 = vector.shape_cast %61 : vector<1x128x128xf32> to vector<128x128xf32>
    %cst_34 = arith.constant dense<0.000000e+00> : vector<8x128xf32>
    %63 = tpu.matmul %60, %62, %cst_34 {dimension_numbers = #tpu.dot_dimension_numbers<[1], [0], [0], [1], [0, 0, 1, 1], [], []>} : vector<8x128xf32>, vector<128x128xf32>, vector<8x128xf32> -> vector<8x128xf32>
    %64 = vector.extract_strided_slice %1 {offsets = [6, 0], sizes = [1, 128], strides = [1, 1]} : vector<128x128xf32> to vector<1x128xf32>
    %65 = vector.broadcast %64 : vector<1x128xf32> to vector<8x128xf32>
    %66 = arith.addf %63, %65 : vector<8x128xf32>
    %cst_35 = arith.constant 0.000000e+00 : f32
    %67 = vector.broadcast %cst_35 : f32 to vector<8x128xf32>
    %68 = arith.maximumf %66, %67 : vector<8x128xf32>
    %c7 = arith.constant 7 : index
    %c0_36 = arith.constant 0 : index
    %c0_37 = arith.constant 0 : index
    %69 = vector.load %arg3[%c7, %c0_36, %c0_37] : memref<13x128x128xf32, #tpu.memory_space<vmem>>, vector<1x128x128xf32>
    %70 = vector.shape_cast %69 : vector<1x128x128xf32> to vector<128x128xf32>
    %cst_38 = arith.constant dense<0.000000e+00> : vector<8x128xf32>
    %71 = tpu.matmul %68, %70, %cst_38 {dimension_numbers = #tpu.dot_dimension_numbers<[1], [0], [0], [1], [0, 0, 1, 1], [], []>} : vector<8x128xf32>, vector<128x128xf32>, vector<8x128xf32> -> vector<8x128xf32>
    %72 = vector.extract_strided_slice %1 {offsets = [7, 0], sizes = [1, 128], strides = [1, 1]} : vector<128x128xf32> to vector<1x128xf32>
    %73 = vector.broadcast %72 : vector<1x128xf32> to vector<8x128xf32>
    %74 = arith.addf %71, %73 : vector<8x128xf32>
    %cst_39 = arith.constant 0.000000e+00 : f32
    %75 = vector.broadcast %cst_39 : f32 to vector<8x128xf32>
    %76 = arith.maximumf %74, %75 : vector<8x128xf32>
    %c8 = arith.constant 8 : index
    %c0_40 = arith.constant 0 : index
    %c0_41 = arith.constant 0 : index
    %77 = vector.load %arg3[%c8, %c0_40, %c0_41] : memref<13x128x128xf32, #tpu.memory_space<vmem>>, vector<1x128x128xf32>
    %78 = vector.shape_cast %77 : vector<1x128x128xf32> to vector<128x128xf32>
    %cst_42 = arith.constant dense<0.000000e+00> : vector<8x128xf32>
    %79 = tpu.matmul %76, %78, %cst_42 {dimension_numbers = #tpu.dot_dimension_numbers<[1], [0], [0], [1], [0, 0, 1, 1], [], []>} : vector<8x128xf32>, vector<128x128xf32>, vector<8x128xf32> -> vector<8x128xf32>
    %80 = vector.extract_strided_slice %1 {offsets = [8, 0], sizes = [1, 128], strides = [1, 1]} : vector<128x128xf32> to vector<1x128xf32>
    %81 = vector.broadcast %80 : vector<1x128xf32> to vector<8x128xf32>
    %82 = arith.addf %79, %81 : vector<8x128xf32>
    %cst_43 = arith.constant 0.000000e+00 : f32
    %83 = vector.broadcast %cst_43 : f32 to vector<8x128xf32>
    %84 = arith.maximumf %82, %83 : vector<8x128xf32>
    %c9 = arith.constant 9 : index
    %c0_44 = arith.constant 0 : index
    %c0_45 = arith.constant 0 : index
    %85 = vector.load %arg3[%c9, %c0_44, %c0_45] : memref<13x128x128xf32, #tpu.memory_space<vmem>>, vector<1x128x128xf32>
    %86 = vector.shape_cast %85 : vector<1x128x128xf32> to vector<128x128xf32>
    %cst_46 = arith.constant dense<0.000000e+00> : vector<8x128xf32>
    %87 = tpu.matmul %84, %86, %cst_46 {dimension_numbers = #tpu.dot_dimension_numbers<[1], [0], [0], [1], [0, 0, 1, 1], [], []>} : vector<8x128xf32>, vector<128x128xf32>, vector<8x128xf32> -> vector<8x128xf32>
    %88 = vector.extract_strided_slice %1 {offsets = [9, 0], sizes = [1, 128], strides = [1, 1]} : vector<128x128xf32> to vector<1x128xf32>
    %89 = vector.broadcast %88 : vector<1x128xf32> to vector<8x128xf32>
    %90 = arith.addf %87, %89 : vector<8x128xf32>
    %cst_47 = arith.constant 0.000000e+00 : f32
    %91 = vector.broadcast %cst_47 : f32 to vector<8x128xf32>
    %92 = arith.maximumf %90, %91 : vector<8x128xf32>
    %c10 = arith.constant 10 : index
    %c0_48 = arith.constant 0 : index
    %c0_49 = arith.constant 0 : index
    %93 = vector.load %arg3[%c10, %c0_48, %c0_49] : memref<13x128x128xf32, #tpu.memory_space<vmem>>, vector<1x128x128xf32>
    %94 = vector.shape_cast %93 : vector<1x128x128xf32> to vector<128x128xf32>
    %cst_50 = arith.constant dense<0.000000e+00> : vector<8x128xf32>
    %95 = tpu.matmul %92, %94, %cst_50 {dimension_numbers = #tpu.dot_dimension_numbers<[1], [0], [0], [1], [0, 0, 1, 1], [], []>} : vector<8x128xf32>, vector<128x128xf32>, vector<8x128xf32> -> vector<8x128xf32>
    %96 = vector.extract_strided_slice %1 {offsets = [10, 0], sizes = [1, 128], strides = [1, 1]} : vector<128x128xf32> to vector<1x128xf32>
    %97 = vector.broadcast %96 : vector<1x128xf32> to vector<8x128xf32>
    %98 = arith.addf %95, %97 : vector<8x128xf32>
    %cst_51 = arith.constant 0.000000e+00 : f32
    %99 = vector.broadcast %cst_51 : f32 to vector<8x128xf32>
    %100 = arith.maximumf %98, %99 : vector<8x128xf32>
    %c11 = arith.constant 11 : index
    %c0_52 = arith.constant 0 : index
    %c0_53 = arith.constant 0 : index
    %101 = vector.load %arg3[%c11, %c0_52, %c0_53] : memref<13x128x128xf32, #tpu.memory_space<vmem>>, vector<1x128x128xf32>
    %102 = vector.shape_cast %101 : vector<1x128x128xf32> to vector<128x128xf32>
    %cst_54 = arith.constant dense<0.000000e+00> : vector<8x128xf32>
    %103 = tpu.matmul %100, %102, %cst_54 {dimension_numbers = #tpu.dot_dimension_numbers<[1], [0], [0], [1], [0, 0, 1, 1], [], []>} : vector<8x128xf32>, vector<128x128xf32>, vector<8x128xf32> -> vector<8x128xf32>
    %104 = vector.extract_strided_slice %1 {offsets = [11, 0], sizes = [1, 128], strides = [1, 1]} : vector<128x128xf32> to vector<1x128xf32>
    %105 = vector.broadcast %104 : vector<1x128xf32> to vector<8x128xf32>
    %106 = arith.addf %103, %105 : vector<8x128xf32>
    %c0_55 = arith.constant 0 : index
    %c0_56 = arith.constant 0 : index
    %107 = vector.load %arg5[%c0_55, %c0_56] : memref<8x128xf32, #tpu.memory_space<vmem>>, vector<8x128xf32>
    tpu.vector_store %arg5[%c0_55, %c0_56], %106 {strides = array<i32>} : memref<8x128xf32, #tpu.memory_space<vmem>>, vector<8x128xf32>,
    return
  }
  func.func @transform_0(%arg0: i32) -> (i32, i32) {
    %c0_i32 = arith.constant 0 : i32
    %c0_i32_0 = arith.constant 0 : i32
    %c0_i32_1 = arith.constant 0 : i32
    return %c0_i32, %c0_i32_0 : i32, i32
  }
  func.func @transform_1(%arg0: i32) -> (i32, i32) {
    %c0_i32 = arith.constant 0 : i32
    %c0_i32_0 = arith.constant 0 : i32
    %c0_i32_1 = arith.constant 0 : i32
    return %c0_i32, %c0_i32_0 : i32, i32
  }
  func.func @transform_2(%arg0: i32) -> (i32, i32, i32) {
    %c0_i32 = arith.constant 0 : i32
    %c0_i32_0 = arith.constant 0 : i32
    %c0_i32_1 = arith.constant 0 : i32
    %c0_i32_2 = arith.constant 0 : i32
    return %c0_i32, %c0_i32_0, %c0_i32_1 : i32, i32, i32
  }
  func.func @transform_3(%arg0: i32) -> (i32, i32) {
    %c0_i32 = arith.constant 0 : i32
    %c0_i32_0 = arith.constant 0 : i32
    %c0_i32_1 = arith.constant 0 : i32
    return %c0_i32, %c0_i32_0 : i32, i32
  }
  func.func @transform_4(%arg0: i32) -> (i32, i32) {
    %c0_i32 = arith.constant 0 : i32
    %c0_i32_0 = arith.constant 0 : i32
    %c0_i32_1 = arith.constant 0 : i32
    return %c0_i32, %c0_i32_0 : i32, i32
  }
}

</mosaic_0001>

<bundles_post_ra>
// kernel: tpu_custom_call.1
= control target key start
LH: loop header
LB: loop body
LE: loop exit
PB: predicated region body
PF: predicated region fallthrough
CT: control target
= control target key end

     0   :  { %10 = vsyncpa [#allocation3], 0  ;;  %s2503_s0 = inlined_call_operand.hbm [shape: f32[8,128], index: 0, kind: input, shape index: {}]   ;;  %s2504_s1 = inlined_call_operand.hbm [shape: f32[8,128], index: 1, kind: input, shape index: {}]   ;;  %s2505_s2 = inlined_call_operand.hbm [shape: f32[13,128,128], index: 2, kind: input, shape index: {}]   ;;  %s2506_s3 = inlined_call_operand.hbm [shape: f32[8,128], index: 3, kind: output, shape index: {0}]   ;;  %s2507_s4 = inlined_call_operand.hbm [shape: f32[8,128], index: 4, kind: output, shape index: {1}]  }
   0x1   :  { %11 = vsyncpa [#allocation6], 0 }
   0x2   :  { %12 = vsyncpa [#allocation4], 0 }
   0x3   :  { %13 = vsyncpa [#allocation10], 0  ;;  %s2244_s15 = smov [#allocation5]   ;;  %s2245_s17 = smov [#allocation2]  }
   0x4   :  { %s30_s16 = sshll.u32 %s2244_s15, 4  ;;  %s20_s18 = sshll.u32 %s2245_s17, 4  ;;  %s31_s16 = int_to_ptr.vmem [resolvable:$true] %s30_s16  ;;  %s21_s18 = int_to_ptr.vmem [resolvable:$true] %s20_s18 }
   0x5   :  { %s2126_s21 = scalar_lea.hbm %s2504_s1, 128 }
   0x6   :  { %p2127_p0 = scmp.ne.s32.totalorder %s2504_s1, %s2126_s21  ;;  %p2130_p1 = scmp.lt.u32.totalorder %s2126_s21, %s2504_s1 }
   0x8   :  { %p2132_p2 = pnand %p2130_p1, %p2127_p0 }
   0xa   :  { %2135 = shalt.err (!%p2132_p2)
}
   0xb   :  { %s2136_s26 = scalar_lea.vmem %s31_s16, 128  ;;  %p2141_p4 = scmp.lt.s32.totalorder %s31_s16, %s31_s16 }
   0xc   :  { %p2137_p3 = scmp.ne.s32.totalorder %s31_s16, %s2136_s26  ;;  %p2142_p5 = scmp.lt.s32.totalorder %s2136_s26, %s2136_s26 }
   0xe   :  { %p2143_p6 = por %p2142_p5, %p2141_p4 }
  0x10   :  { %p2144_p7 = pnand %p2143_p6, %p2137_p3 }
  0x12   :  { %2147 = shalt.err (!%p2144_p7)
}
  0x13   :  { %33 = dma.hbm_to_vmem [thread:$0]  %s2504_s1, 128, %s31_s16, [#allocation6]  }
  0x14   :  { %s2148_s5 = scalar_lea.hbm %s2503_s0, 128 }
  0x15   :  { %p2149_p8 = scmp.ne.s32.totalorder %s2503_s0, %s2148_s5  ;;  %p2152_p9 = scmp.lt.u32.totalorder %s2148_s5, %s2503_s0 }
  0x17   :  { %p2154_p10 = pnand %p2152_p9, %p2149_p8 }
  0x19   :  { %2157 = shalt.err (!%p2154_p10)
}
  0x1a   :  { %s2158_s10 = scalar_lea.vmem %s21_s18, 128  ;;  %p2163_p12 = scmp.lt.s32.totalorder %s21_s18, %s21_s18 }
  0x1b   :  { %p2159_p11 = scmp.ne.s32.totalorder %s21_s18, %s2158_s10  ;;  %p2164_p13 = scmp.lt.s32.totalorder %s2158_s10, %s2158_s10 }
  0x1d   :  { %p2165_p0 = por %p2164_p13, %p2163_p12 }
  0x1f   :  { %p2166_p1 = pnand %p2165_p0, %p2159_p11 }
  0x21   :  { %2169 = shalt.err (!%p2166_p1)
}
  0x22   :  { %23 = dma.hbm_to_vmem [thread:$0]  %s2503_s0, 128, %s21_s18, [#allocation3]  }
  0x23   :  { %s2246_s12 = smov [#allocation7]   ;;  %s2170_s16 = scalar_lea.hbm %s2505_s2, 26624 }
  0x24   :  { %s39_s13 = sshll.u32 %s2246_s12, 4  ;;  %p2171_p2 = scmp.ne.s32.totalorder %s2505_s2, %s2170_s16  ;;  %s40_s13 = int_to_ptr.vmem [resolvable:$true] %s39_s13 }
  0x25   :  { %p2174_p3 = scmp.lt.u32.totalorder %s2170_s16, %s2505_s2 }
  0x27   :  { %p2176_p4 = pnand %p2174_p3, %p2171_p2 }
  0x29   :  { %2179 = shalt.err (!%p2176_p4)
}
  0x2a   :  { %s2180_s22 = scalar_lea.vmem %s40_s13, 26624  ;;  %p2185_p6 = scmp.lt.s32.totalorder %s40_s13, %s40_s13 }
  0x2b   :  { %p2181_p5 = scmp.ne.s32.totalorder %s40_s13, %s2180_s22  ;;  %p2186_p7 = scmp.lt.s32.totalorder %s2180_s22, %s2180_s22 }
  0x2d   :  { %p2187_p8 = por %p2186_p7, %p2185_p6 }
  0x2f   :  { %p2188_p9 = pnand %p2187_p8, %p2181_p5 }
  0x31   :  { %2191 = shalt.err (!%p2188_p9)
}
  0x32   :  { %s2247_s0 = smov 128   ;;  %s2248_s18 = smov 8  }
  0x33   :  { %45 = dma.hbm_to_vmem [thread:$0]  %s2505_s2, 26624, %s40_s13, [#allocation6], %s2247_s0, %s2247_s0, %s2248_s18  }
  0x34   :  { %2236 = dma.done.wait [#allocation3], 128  }
  0x35   :  { %2237 = vsyncadd [#allocation3], 4294967168 }
  0x36   :  { %2238 = dma.done.wait [#allocation6], 26752  }
  0x37   :  { %2239 = vsyncadd [#allocation6], 4294940544  ;;  %v2249_v0 = vmov 0.0|0.0   ;;  %vm2250_vm0 = vmmov 0   ;;  %v2251_v1 = vmov 0.0   ;;  %v59_v2 = vld [vmem:[#allocation7] sm:$0xff] }
  0x38   :  { %1826 = vmatprep.subr.bf16.mxu0 %v2249_v0  ;;  %1438 = vmatprep.mubr.msk.f32.mxu0 %vm2250_vm0, %v2251_v1  ;;  %v60_v3 = vld [vmem:[#allocation7 + $0x8] sm:$0xff]  ;;  %v61_v4 = vld [vmem:[#allocation7 + $0x10] sm:$0xff]  ;;  %v62_v6 = vld [vmem:[#allocation7 + $0x18] sm:$0xff]  ;;  %s2252_s2 = smov [#allocation8]  }
  0x39   :  { %1850 = vmatprep.subr.bf16.mxu1 %v2249_v0  ;;  %1473 = vmatprep.mubr.msk.f32.mxu1 %vm2250_vm0, %v2251_v1  ;;  %v1827_v5 = vpack.c.bf16 %v60_v3, %v59_v2  ;;  %v1830_v7 = vpack.c.bf16 %v62_v6, %v61_v4  ;;  %v63_v8 = vld [vmem:[#allocation7 + $0x20] sm:$0xff]  ;;  %v64_v9 = vld [vmem:[#allocation7 + $0x28] sm:$0xff]  ;;  %v153_v12 = vld [vmem:[#allocation7 + $0x90] sm:$0xff]  ;;  %s1178_s25 = sshll.u32 %s2252_s2, 4  ;;  %s1179_s25 = int_to_ptr.vmem [resolvable:$true] %s1178_s25 }
  0x3a   :  { %v151_v10 = vld [vmem:[#allocation7 + $0x80] sm:$0xff]  ;;  %v152_v11 = vld [vmem:[#allocation7 + $0x88] sm:$0xff]  ;;  %v154_v13 = vld [vmem:[#allocation7 + $0x98] sm:$0xff]  ;;  %v1833_v14 = vpack.c.bf16 %v64_v9, %v63_v8  ;;  %s2192_s26 = scalar_lea.vmem %s1179_s25, 128  ;;  %p2197_p11 = scmp.lt.s32.totalorder %s1179_s25, %s1179_s25 }
  0x3b   :  { %1828 = vmatpush3.bf16.msra.mxu0 %v1827_v5  ;;  %v1851_v15 = vpack.c.bf16 %v152_v11, %v151_v10  ;;  %v65_v16 = vld [vmem:[#allocation7 + $0x30] sm:$0xff]  ;;  %v66_v17 = vld [vmem:[#allocation7 + $0x38] sm:$0xff]  ;;  %v1854_v18 = vpack.c.bf16 %v154_v13, %v153_v12  ;;  %v155_v19 = vld [vmem:[#allocation7 + $0xa0] sm:$0xff]  ;;  %v75_v10 = vlaneseq  ;;  %p2193_p10 = scmp.ne.s32.totalorder %s1179_s25, %s2192_s26  ;;  %p2198_p12 = scmp.lt.s32.totalorder %s2192_s26, %s2192_s26 }
  0x3c   :  { %1829 = vmatprep.subr.bf16.mxu0 %v2249_v0  ;;  %v156_v20 = vld [vmem:[#allocation7 + $0xa8] sm:$0xff]  ;;  %v1836_v21 = vpack.c.bf16 %v66_v17, %v65_v16  ;;  %v67_v22 = vld [vmem:[#allocation7 + $0x40] sm:$0xff]  ;;  %v157_v25 = vld [vmem:[#allocation7 + $0xb0] sm:$0xff] }
  0x3d   :  { %1852 = vmatpush3.bf16.msra.mxu1 %v1851_v15  ;;  %v68_v23 = vld [vmem:[#allocation7 + $0x48] sm:$0xff]  ;;  %v1857_v24 = vpack.c.bf16 %v156_v20, %v155_v19  ;;  %v158_v26 = vld [vmem:[#allocation7 + $0xb8] sm:$0xff]  ;;  %v69_v28 = vld [vmem:[#allocation7 + $0x50] sm:$0xff]  ;;  %v2347_v11 = vshrl.u32 %v75_v10, 7  ;;  %p2199_p13 = por %p2198_p12, %p2197_p11 }
  0x3e   :  { %1853 = vmatprep.subr.bf16.mxu1 %v2249_v0  ;;  %v1839_v27 = vpack.c.bf16 %v68_v23, %v67_v22  ;;  %v70_v29 = vld [vmem:[#allocation7 + $0x58] sm:$0xff]  ;;  %v1860_v30 = vpack.c.bf16 %v158_v26, %v157_v25  ;;  %v159_v31 = vld [vmem:[#allocation7 + $0xc0] sm:$0xff]  ;;  %v160_v32 = vld [vmem:[#allocation7 + $0xc8] sm:$0xff] }
  0x3f   :  { %1831 = vmatpush3.bf16.msra.mxu0 %v1830_v7  ;;  %v1842_v33 = vpack.c.bf16 %v70_v29, %v69_v28  ;;  %v71_v34 = vld [vmem:[#allocation7 + $0x60] sm:$0xff]  ;;  %v72_v35 = vld [vmem:[#allocation7 + $0x68] sm:$0xff]  ;;  %v1863_v36 = vpack.c.bf16 %v160_v32, %v159_v31  ;;  %v161_v37 = vld [vmem:[#allocation7 + $0xd0] sm:$0xff]  ;;  %v77_v12 = vsub.s32 0, %v2347_v11  ;;  %p2200_p0 = pnand %p2199_p13, %p2193_p10 }
  0x40   :  { %1832 = vmatprep.subr.bf16.mxu0 %v2249_v0  ;;  %v162_v38 = vld [vmem:[#allocation7 + $0xd8] sm:$0xff]  ;;  %v1845_v39 = vpack.c.bf16 %v72_v35, %v71_v34  ;;  %v73_v40 = vld [vmem:[#allocation7 + $0x70] sm:$0xff]  ;;  %v163_v43 = vld [vmem:[#allocation7 + $0xe0] sm:$0xff] }
  0x41   :  { %1855 = vmatpush3.bf16.msra.mxu1 %v1854_v18  ;;  %v74_v41 = vld [vmem:[#allocation7 + $0x78] sm:$0xff]  ;;  %v1866_v42 = vpack.c.bf16 %v162_v38, %v161_v37  ;;  %v164_v44 = vld [vmem:[#allocation7 + $0xe8] sm:$0xff]  ;;  %v58_v47 = vld [vmem:[#allocation2] sm:$0xff] }
  0x42   :  { %1856 = vmatprep.subr.bf16.mxu1 %v2249_v0  ;;  %v1848_v45 = vpack.c.bf16 %v74_v41, %v73_v40  ;;  %v1869_v46 = vpack.c.bf16 %v164_v44, %v163_v43  ;;  %v165_v48 = vld [vmem:[#allocation7 + $0xf0] sm:$0xff]  ;;  %v166_v49 = vld [vmem:[#allocation7 + $0xf8] sm:$0xff]  ;;  %v243_v51 = vld [vmem:[#allocation7 + $0x100] sm:$0xff]  ;;  %v169_v43 = vsub.s32 1, %v2347_v11 }
  0x43   :  { %1834 = vmatpush3.bf16.msra.mxu0 %v1833_v14  ;;  %v1872_v50 = vpack.c.bf16 %v166_v49, %v165_v48  ;;  %v244_v52 = vld [vmem:[#allocation7 + $0x108] sm:$0xff]  ;;  %v245_v53 = vld [vmem:[#allocation7 + $0x110] sm:$0xff]  ;;  %v246_v55 = vld [vmem:[#allocation7 + $0x118] sm:$0xff] }
  0x44   :  { %1835 = vmatprep.subr.bf16.mxu0 %v2249_v0  ;;  %v1875_v54 = vpack.c.bf16 %v244_v52, %v243_v51  ;;  %v1878_v56 = vpack.c.bf16 %v246_v55, %v245_v53  ;;  %v247_v57 = vld [vmem:[#allocation7 + $0x120] sm:$0xff]  ;;  %v248_v58 = vld [vmem:[#allocation7 + $0x128] sm:$0xff]  ;;  %v249_v60 = vld [vmem:[#allocation7 + $0x130] sm:$0xff] }
  0x45   :  { %1858 = vmatpush3.bf16.msra.mxu1 %v1857_v24  ;;  %v1881_v59 = vpack.c.bf16 %v248_v58, %v247_v57  ;;  %v250_v61 = vld [vmem:[#allocation7 + $0x138] sm:$0xff]  ;;  %v251_v63 = vld [vmem:[#allocation7 + $0x140] sm:$0xff]  ;;  %v252_v2 = vld [vmem:[#allocation7 + $0x148] sm:$0xff] }
  0x46   :  { %1859 = vmatprep.subr.bf16.mxu1 %v2249_v0  ;;  %v1884_v62 = vpack.c.bf16 %v250_v61, %v249_v60  ;;  %v1887_v3 = vpack.c.bf16 %v252_v2, %v251_v63  ;;  %v253_v4 = vld [vmem:[#allocation7 + $0x150] sm:$0xff]  ;;  %v254_v5 = vld [vmem:[#allocation7 + $0x158] sm:$0xff]  ;;  %v255_v7 = vld [vmem:[#allocation7 + $0x160] sm:$0xff] }
  0x47   :  { %1837 = vmatpush3.bf16.msra.mxu0 %v1836_v21  ;;  %v1890_v6 = vpack.c.bf16 %v254_v5, %v253_v4  ;;  %v256_v8 = vld [vmem:[#allocation7 + $0x168] sm:$0xff]  ;;  %v2350_v13 = vld [vmem:[#allocation7 + $0x600] sm:$0xff]  ;;  %v257_v19 = vld [vmem:[#allocation7 + $0x170] sm:$0xff] }
  0x48   :  { %1838 = vmatprep.subr.bf16.mxu0 %v2249_v0  ;;  %v1893_v9 = vpack.c.bf16 %v256_v8, %v255_v7  ;;  %v78_v14 = vrot.slane %v2350_v13, %v77_v12  ;;  %v258_v20 = vld [vmem:[#allocation7 + $0x178] sm:$0xff]  ;;  %v335_v22 = vld [vmem:[#allocation7 + $0x180] sm:$0xff]  ;;  %v336_v23 = vld [vmem:[#allocation7 + $0x188] sm:$0xff]  ;;  %v170_v44 = vrot.slane %v2350_v13, %v169_v43 }
  0x49   :  { %1861 = vmatpush3.bf16.msra.mxu1 %v1860_v30  ;;  %v1896_v21 = vpack.c.bf16 %v258_v20, %v257_v19  ;;  %v337_v24 = vld [vmem:[#allocation7 + $0x190] sm:$0xff]  ;;  %v1899_v25 = vpack.c.bf16 %v336_v23, %v335_v22  ;;  %v338_v26 = vld [vmem:[#allocation7 + $0x198] sm:$0xff]  ;;  %v339_v28 = vld [vmem:[#allocation7 + $0x1a0] sm:$0xff] }
  0x4a   :  { %1862 = vmatprep.subr.bf16.mxu1 %v2249_v0  ;;  %v340_v29 = vld [vmem:[#allocation7 + $0x1a8] sm:$0xff]  ;;  %v341_v31 = vld [vmem:[#allocation7 + $0x1b0] sm:$0xff]  ;;  %v342_v32 = vld [vmem:[#allocation7 + $0x1b8] sm:$0xff] }
  0x4b   :  { %1840 = vmatpush3.bf16.msra.mxu0 %v1839_v27  ;;  %v1902_v27 = vpack.c.bf16 %v338_v26, %v337_v24  ;;  %v1905_v30 = vpack.c.bf16 %v340_v29, %v339_v28  ;;  %v343_v34 = vld [vmem:[#allocation7 + $0x1c0] sm:$0xff]  ;;  %v344_v35 = vld [vmem:[#allocation7 + $0x1c8] sm:$0xff]  ;;  %v345_v37 = vld [vmem:[#allocation7 + $0x1d0] sm:$0xff] }
  0x4c   :  { %1841 = vmatprep.subr.bf16.mxu0 %v2249_v0  ;;  %v346_v38 = vld [vmem:[#allocation7 + $0x1d8] sm:$0xff]  ;;  %v347_v40 = vld [vmem:[#allocation7 + $0x1e0] sm:$0xff]  ;;  %v348_v41 = vld [vmem:[#allocation7 + $0x1e8] sm:$0xff] }
  0x4d   :  { %1864 = vmatpush3.bf16.msra.mxu1 %v1863_v36  ;;  %v1911_v36 = vpack.c.bf16 %v344_v35, %v343_v34  ;;  %v349_v49 = vld [vmem:[#allocation7 + $0x1f0] sm:$0xff]  ;;  %v427_v52 = vld [vmem:[#allocation7 + $0x200] sm:$0xff]  ;;  %v428_v53 = vld [vmem:[#allocation7 + $0x208] sm:$0xff] }
  0x4e   :  { %1865 = vmatprep.subr.bf16.mxu1 %v2249_v0  ;;  %v1923_v55 = vpack.c.bf16 %v428_v53, %v427_v52  ;;  %v431_v58 = vld [vmem:[#allocation7 + $0x220] sm:$0xff]  ;;  %v433_v61 = vld [vmem:[#allocation7 + $0x230] sm:$0xff]  ;;  %v442_v22 = vld [vmem:[#allocation7 + $0x278] sm:$0xff] }
  0x4f   :  { %1843 = vmatpush3.bf16.msra.mxu0 %v1842_v33  ;;  %v1908_v33 = vpack.c.bf16 %v342_v32, %v341_v31  ;;  %v435_v2 = vld [vmem:[#allocation7 + $0x240] sm:$0xff]  ;;  %v437_v5 = vld [vmem:[#allocation7 + $0x250] sm:$0xff]  ;;  %v522_v28 = vld [vmem:[#allocation7 + $0x298] sm:$0xff] }
  0x50   :  { %1844 = vmatprep.subr.bf16.mxu0 %v2249_v0  ;;  %v439_v8 = vld [vmem:[#allocation7 + $0x260] sm:$0xff]  ;;  %v521_v26 = vld [vmem:[#allocation7 + $0x290] sm:$0xff]  ;;  %v524_v31 = vld [vmem:[#allocation7 + $0x2a8] sm:$0xff] }
  0x51   :  { %1867 = vmatpush3.bf16.msra.mxu1 %v1866_v42  ;;  %v1917_v42 = vpack.c.bf16 %v348_v41, %v347_v40  ;;  %v519_v24 = vld [vmem:[#allocation7 + $0x280] sm:$0xff]  ;;  %v1950_v29 = vpack.c.bf16 %v522_v28, %v521_v26  ;;  %v526_v34 = vld [vmem:[#allocation7 + $0x2b8] sm:$0xff]  ;;  %v533_v52 = vld [vmem:[#allocation7 + $0x2f0] sm:$0xff] }
  0x52   :  { %1868 = vmatprep.subr.bf16.mxu1 %v2249_v0  ;;  %v530_v40 = vld [vmem:[#allocation7 + $0x2d8] sm:$0xff]  ;;  %v713_v28 = vld [vmem:[#allocation7 + $0x380] sm:$0xff] }
  0x53   :  { %1846 = vmatpush3.bf16.msra.mxu0 %v1845_v39  ;;  %v1914_v39 = vpack.c.bf16 %v346_v38, %v345_v37  ;;  %v528_v37 = vld [vmem:[#allocation7 + $0x2c8] sm:$0xff]  ;;  %v534_v53 = vld [vmem:[#allocation7 + $0x2f8] sm:$0xff] }
  0x54   :  { %1847 = vmatprep.subr.bf16.mxu0 %v2249_v0  ;;  %v636_v26 = vld [vmem:[#allocation7 + $0x378] sm:$0xff] }
  0x55   :  { %1870 = vmatpush3.bf16.msra.mxu1 %v1869_v46 }
  0x56   :  { %1871 = vmatprep.subr.bf16.mxu1 %v2249_v0 }
  0x57   :  { %1849 = vmatpush3.bf16.msra.mxu0 %v1848_v45 }
  0x58   :  { %1874 = vmatprep.subr.bf16.mxu0 %v2249_v0 }
  0x59   :  { %1873 = vmatpush3.bf16.msra.mxu1 %v1872_v50  ;;  %v350_v50 = vld [vmem:[#allocation7 + $0x1f8] sm:$0xff] }
  0x5a   :  { %1439 = vmatmul.mubr.f32.vlgmr.msra.gmra.mrb[0].mxu0 %v58_v47  ;;  %1898 = vmatprep.subr.bf16.mxu1 %v2249_v0  ;;  %v1920_v51 = vpack.c.bf16 %v350_v50, %v349_v49 }
  0x5b   :  { %1508 = vmatprep.mubr.msk.f32.mxu0 %vm2250_vm0, %v2251_v1  ;;  %1876 = vmatpush3.bf16.msra.mxu0 %v1875_v54  ;;  %v429_v54 = vld [vmem:[#allocation7 + $0x210] sm:$0xff] }
  0x5c   :  { %1877 = vmatprep.subr.bf16.mxu0 %v2249_v0 }
  0x5f   :  { %1879 = vmatpush3.bf16.msra.mxu0 %v1878_v56  ;;  %v430_v56 = vld [vmem:[#allocation7 + $0x218] sm:$0xff] }
  0x60   :  { %1880 = vmatprep.subr.bf16.mxu0 %v2249_v0  ;;  %v1926_v57 = vpack.c.bf16 %v430_v56, %v429_v54  ;;  %v1968_v54 = vpack.c.bf16 %v534_v53, %v533_v52  ;;  %v622_v56 = vld [vmem:[#allocation7 + $0x308] sm:$0xff] }
  0x63   :  { %1882 = vmatpush3.bf16.msra.mxu0 %v1881_v59  ;;  %v432_v59 = vld [vmem:[#allocation7 + $0x228] sm:$0xff] }
  0x64   :  { %1883 = vmatprep.subr.bf16.mxu0 %v2249_v0  ;;  %v1929_v60 = vpack.c.bf16 %v432_v59, %v431_v58  ;;  %v624_v59 = vld [vmem:[#allocation7 + $0x318] sm:$0xff] }
  0x67   :  { %1885 = vmatpush3.bf16.msra.mxu0 %v1884_v62  ;;  %v434_v62 = vld [vmem:[#allocation7 + $0x238] sm:$0xff] }
  0x68   :  { %1886 = vmatprep.subr.bf16.mxu0 %v2249_v0  ;;  %v1932_v63 = vpack.c.bf16 %v434_v62, %v433_v61  ;;  %v625_v61 = vld [vmem:[#allocation7 + $0x320] sm:$0xff]  ;;  %v626_v62 = vld [vmem:[#allocation7 + $0x328] sm:$0xff] }
  0x6b   :  { %1888 = vmatpush3.bf16.msra.mxu0 %v1887_v3  ;;  %v436_v3 = vld [vmem:[#allocation7 + $0x248] sm:$0xff] }
  0x6c   :  { %1889 = vmatprep.subr.bf16.mxu0 %v2249_v0  ;;  %v1935_v4 = vpack.c.bf16 %v436_v3, %v435_v2  ;;  %v445_v2 = vsub.s32 4, %v2347_v11 }
  0x6e   :  { %v446_v3 = vrot.slane %v2350_v13, %v445_v2  ;;  %v727_v2 = vld [vmem:[#allocation7 + $0x3f0] sm:$0xff] }
  0x6f   :  { %1891 = vmatpush3.bf16.msra.mxu0 %v1890_v6  ;;  %v438_v6 = vld [vmem:[#allocation7 + $0x258] sm:$0xff] }
  0x70   :  { %1892 = vmatprep.subr.bf16.mxu0 %v2249_v0  ;;  %v1938_v7 = vpack.c.bf16 %v438_v6, %v437_v5 }
  0x73   :  { %1894 = vmatpush3.bf16.msra.mxu0 %v1893_v9  ;;  %v440_v9 = vld [vmem:[#allocation7 + $0x268] sm:$0xff] }
  0x74   :  { %1895 = vmatprep.subr.bf16.mxu0 %v2249_v0 }
  0x77   :  { %1897 = vmatpush3.bf16.msra.mxu0 %v1896_v21  ;;  %v441_v21 = vld [vmem:[#allocation7 + $0x270] sm:$0xff] }
  0x78   :  { %1922 = vmatprep.subr.bf16.mxu0 %v2249_v0  ;;  %v1944_v23 = vpack.c.bf16 %v442_v22, %v441_v21  ;;  %v633_v22 = vld [vmem:[#allocation7 + $0x360] sm:$0xff] }
 0x12d   :  { %v145_v15 = vpop.f32.mrb[0].mxu0 }
 0x12e   :  { %v146_v16 = vadd.f32 %v145_v15, %v78_v14  ;;  %v1440_v17 = vpop.f32.mrb[1].mxu0  ;;  %v1941_v14 = vpack.c.bf16 %v440_v9, %v439_v8  ;;  %v261_v15 = vsub.s32 2, %v2347_v11  ;;  %v627_v8 = vld [vmem:[#allocation7 + $0x330] sm:$0xff]  ;;  %v628_v9 = vld [vmem:[#allocation7 + $0x338] sm:$0xff] }
 0x130   :  { %v149_v18 = vmax.f32 %v146_v16, 0.0  ;;  %v262_v16 = vrot.slane %v2350_v13, %v261_v15 }
 0x132   :  { %1474 = vmatmul.mubr.f32.vlgmr.msra.gmra.mrb[0].mxu1 %v149_v18 }
 0x133   :  { %1543 = vmatprep.mubr.msk.f32.mxu1 %vm2250_vm0, %v2251_v1  ;;  %1900 = vmatpush3.bf16.msra.mxu1 %v1899_v25  ;;  %v520_v25 = vld [vmem:[#allocation7 + $0x288] sm:$0xff] }
 0x134   :  { %1901 = vmatprep.subr.bf16.mxu1 %v2249_v0 }
 0x137   :  { %1903 = vmatpush3.bf16.msra.mxu1 %v1902_v27  ;;  %v1947_v27 = vpack.c.bf16 %v520_v25, %v519_v24  ;;  %v635_v25 = vld [vmem:[#allocation7 + $0x370] sm:$0xff] }
 0x138   :  { %1904 = vmatprep.subr.bf16.mxu1 %v2249_v0 }
 0x13b   :  { %1906 = vmatpush3.bf16.msra.mxu1 %v1905_v30  ;;  %v523_v30 = vld [vmem:[#allocation7 + $0x2a0] sm:$0xff] }
 0x13c   :  { %1907 = vmatprep.subr.bf16.mxu1 %v2249_v0  ;;  %v1953_v32 = vpack.c.bf16 %v524_v31, %v523_v30  ;;  %v715_v30 = vld [vmem:[#allocation7 + $0x390] sm:$0xff] }
 0x13f   :  { %1909 = vmatpush3.bf16.msra.mxu1 %v1908_v33  ;;  %v525_v33 = vld [vmem:[#allocation7 + $0x2b0] sm:$0xff] }
 0x140   :  { %1910 = vmatprep.subr.bf16.mxu1 %v2249_v0  ;;  %v1956_v35 = vpack.c.bf16 %v526_v34, %v525_v33  ;;  %v717_v34 = vld [vmem:[#allocation7 + $0x3a0] sm:$0xff] }
 0x143   :  { %1912 = vmatpush3.bf16.msra.mxu1 %v1911_v36  ;;  %v527_v36 = vld [vmem:[#allocation7 + $0x2c0] sm:$0xff] }
 0x144   :  { %1913 = vmatprep.subr.bf16.mxu1 %v2249_v0  ;;  %v1959_v38 = vpack.c.bf16 %v528_v37, %v527_v36  ;;  %v719_v37 = vld [vmem:[#allocation7 + $0x3b0] sm:$0xff] }
 0x147   :  { %1915 = vmatpush3.bf16.msra.mxu1 %v1914_v39  ;;  %v529_v39 = vld [vmem:[#allocation7 + $0x2d0] sm:$0xff] }
 0x148   :  { %1916 = vmatprep.subr.bf16.mxu1 %v2249_v0  ;;  %v1962_v41 = vpack.c.bf16 %v530_v40, %v529_v39  ;;  %v721_v40 = vld [vmem:[#allocation7 + $0x3c0] sm:$0xff] }
 0x14b   :  { %1918 = vmatpush3.bf16.msra.mxu1 %v1917_v42  ;;  %v531_v42 = vld [vmem:[#allocation7 + $0x2e0] sm:$0xff] }
 0x14c   :  { %1919 = vmatprep.subr.bf16.mxu1 %v2249_v0 }
 0x14f   :  { %1921 = vmatpush3.bf16.msra.mxu1 %v1920_v51 }
 0x150   :  { %1946 = vmatprep.subr.bf16.mxu1 %v2249_v0 }
 0x205   :  { %v237_v45 = vpop.f32.mrb[0].mxu1 }
 0x206   :  { %v238_v46 = vadd.f32 %v237_v45, %v170_v44  ;;  %v1475_v47 = vpop.f32.mrb[1].mxu1  ;;  %v532_v44 = vld [vmem:[#allocation7 + $0x2e8] sm:$0xff] }
 0x207   :  { %v1965_v45 = vpack.c.bf16 %v532_v44, %v531_v42  ;;  %v723_v44 = vld [vmem:[#allocation7 + $0x3d0] sm:$0xff] }
 0x208   :  { %v241_v48 = vmax.f32 %v238_v46, 0.0  ;;  %v353_v46 = vsub.s32 3, %v2347_v11 }
 0x20a   :  { %1509 = vmatmul.mubr.f32.vlgmr.msra.gmra.mrb[2].mxu0 %v241_v48  ;;  %v354_v47 = vrot.slane %v2350_v13, %v353_v46 }
 0x20b   :  { %1578 = vmatprep.mubr.msk.f32.mxu0 %vm2250_vm0, %v2251_v1  ;;  %1924 = vmatpush3.bf16.msra.mxu0 %v1923_v55  ;;  %v621_v55 = vld [vmem:[#allocation7 + $0x300] sm:$0xff] }
 0x20c   :  { %1925 = vmatprep.subr.bf16.mxu0 %v2249_v0  ;;  %v1971_v58 = vpack.c.bf16 %v622_v56, %v621_v55 }
 0x20f   :  { %1927 = vmatpush3.bf16.msra.mxu0 %v1926_v57  ;;  %v623_v57 = vld [vmem:[#allocation7 + $0x310] sm:$0xff] }
 0x210   :  { %1928 = vmatprep.subr.bf16.mxu0 %v2249_v0 }
 0x213   :  { %1930 = vmatpush3.bf16.msra.mxu0 %v1929_v60  ;;  %v1974_v60 = vpack.c.bf16 %v624_v59, %v623_v57  ;;  %v612_v59 = vld [vmem:[#allocation5] sm:$0xff] }
 0x214   :  { %1931 = vmatprep.subr.bf16.mxu0 %v2249_v0 }
 0x217   :  { %1933 = vmatpush3.bf16.msra.mxu0 %v1932_v63  ;;  %v1977_v63 = vpack.c.bf16 %v626_v62, %v625_v61 }
 0x218   :  { %1934 = vmatprep.subr.bf16.mxu0 %v2249_v0 }
 0x21b   :  { %1936 = vmatpush3.bf16.msra.mxu0 %v1935_v4 }
 0x21c   :  { %1937 = vmatprep.subr.bf16.mxu0 %v2249_v0 }
 0x21f   :  { %1939 = vmatpush3.bf16.msra.mxu0 %v1938_v7 }
 0x220   :  { %1940 = vmatprep.subr.bf16.mxu0 %v2249_v0 }
 0x223   :  { %1942 = vmatpush3.bf16.msra.mxu0 %v1941_v14  ;;  %v1980_v14 = vpack.c.bf16 %v628_v9, %v627_v8  ;;  %v808_v8 = vld [vmem:[#allocation7 + $0x418] sm:$0xff] }
 0x224   :  { %1943 = vmatprep.subr.bf16.mxu0 %v2249_v0 }
 0x227   :  { %1945 = vmatpush3.bf16.msra.mxu0 %v1944_v23  ;;  %v634_v23 = vld [vmem:[#allocation7 + $0x368] sm:$0xff] }
 0x228   :  { %1970 = vmatprep.subr.bf16.mxu0 %v2249_v0  ;;  %v1989_v24 = vpack.c.bf16 %v634_v23, %v633_v22  ;;  %v814_v22 = vld [vmem:[#allocation7 + $0x448] sm:$0xff] }
 0x2dd   :  { %v329_v17 = vpop.f32.mrb[2].mxu0 }
 0x2de   :  { %v330_v18 = vadd.f32 %v329_v17, %v262_v16  ;;  %v1510_v19 = vpop.f32.mrb[3].mxu0  ;;  %v629_v16 = vld [vmem:[#allocation7 + $0x340] sm:$0xff]  ;;  %v630_v17 = vld [vmem:[#allocation7 + $0x348] sm:$0xff] }
 0x2df   :  { %v631_v19 = vld [vmem:[#allocation7 + $0x350] sm:$0xff] }
 0x2e0   :  { %v333_v20 = vmax.f32 %v330_v18, 0.0  ;;  %v1983_v18 = vpack.c.bf16 %v630_v17, %v629_v16  ;;  %v810_v16 = vld [vmem:[#allocation7 + $0x428] sm:$0xff] }
 0x2e2   :  { %1544 = vmatmul.mubr.f32.vlgmr.msra.gmra.mrb[2].mxu1 %v333_v20  ;;  %v632_v20 = vld [vmem:[#allocation7 + $0x358] sm:$0xff] }
 0x2e3   :  { %1613 = vmatprep.mubr.msk.f32.mxu1 %vm2250_vm0, %v2251_v1  ;;  %1948 = vmatpush3.bf16.msra.mxu1 %v1947_v27  ;;  %v1986_v21 = vpack.c.bf16 %v632_v20, %v631_v19  ;;  %v1992_v27 = vpack.c.bf16 %v636_v26, %v635_v25  ;;  %v812_v19 = vld [vmem:[#allocation7 + $0x438] sm:$0xff] }
 0x2e4   :  { %1949 = vmatprep.subr.bf16.mxu1 %v2249_v0  ;;  %v816_v25 = vld [vmem:[#allocation7 + $0x458] sm:$0xff] }
 0x2e7   :  { %1951 = vmatpush3.bf16.msra.mxu1 %v1950_v29  ;;  %v714_v29 = vld [vmem:[#allocation7 + $0x388] sm:$0xff] }
 0x2e8   :  { %1952 = vmatprep.subr.bf16.mxu1 %v2249_v0  ;;  %v1995_v31 = vpack.c.bf16 %v714_v29, %v713_v28  ;;  %v818_v28 = vld [vmem:[#allocation7 + $0x468] sm:$0xff] }
 0x2eb   :  { %1954 = vmatpush3.bf16.msra.mxu1 %v1953_v32  ;;  %v716_v32 = vld [vmem:[#allocation7 + $0x398] sm:$0xff] }
 0x2ec   :  { %1955 = vmatprep.subr.bf16.mxu1 %v2249_v0  ;;  %v1998_v33 = vpack.c.bf16 %v716_v32, %v715_v30  ;;  %v639_v30 = vsub.s32 6, %v2347_v11 }
 0x2ef   :  { %1957 = vmatpush3.bf16.msra.mxu1 %v1956_v35  ;;  %v718_v35 = vld [vmem:[#allocation7 + $0x3a8] sm:$0xff] }
 0x2f0   :  { %1958 = vmatprep.subr.bf16.mxu1 %v2249_v0  ;;  %v2001_v36 = vpack.c.bf16 %v718_v35, %v717_v34 }
 0x2f3   :  { %1960 = vmatpush3.bf16.msra.mxu1 %v1959_v38  ;;  %v720_v38 = vld [vmem:[#allocation7 + $0x3b8] sm:$0xff] }
 0x2f4   :  { %1961 = vmatprep.subr.bf16.mxu1 %v2249_v0  ;;  %v2004_v39 = vpack.c.bf16 %v720_v38, %v719_v37  ;;  %v820_v37 = vld [vmem:[#allocation7 + $0x478] sm:$0xff] }
 0x2f7   :  { %1963 = vmatpush3.bf16.msra.mxu1 %v1962_v41  ;;  %v722_v41 = vld [vmem:[#allocation7 + $0x3c8] sm:$0xff] }
 0x2f8   :  { %1964 = vmatprep.subr.bf16.mxu1 %v2249_v0  ;;  %v2007_v42 = vpack.c.bf16 %v722_v41, %v721_v40  ;;  %v898_v40 = vld [vmem:[#allocation7 + $0x488] sm:$0xff]  ;;  %v899_v41 = vld [vmem:[#allocation7 + $0x490] sm:$0xff] }
 0x2fb   :  { %1966 = vmatpush3.bf16.msra.mxu1 %v1965_v45  ;;  %v724_v45 = vld [vmem:[#allocation7 + $0x3d8] sm:$0xff] }
 0x2fc   :  { %1967 = vmatprep.subr.bf16.mxu1 %v2249_v0 }
 0x2ff   :  { %1969 = vmatpush3.bf16.msra.mxu1 %v1968_v54 }
 0x300   :  { %1994 = vmatprep.subr.bf16.mxu1 %v2249_v0 }
 0x3b5   :  { %v421_v48 = vpop.f32.mrb[2].mxu1 }
 0x3b6   :  { %v422_v49 = vadd.f32 %v421_v48, %v354_v47  ;;  %v1545_v50 = vpop.f32.mrb[3].mxu1  ;;  %v2010_v47 = vpack.c.bf16 %v724_v45, %v723_v44  ;;  %v725_v48 = vld [vmem:[#allocation7 + $0x3e0] sm:$0xff]  ;;  %v900_v44 = vld [vmem:[#allocation7 + $0x498] sm:$0xff] }
 0x3b7   :  { %v2046_v45 = vpack.c.bf16 %v900_v44, %v899_v41  ;;  %v1082_v44 = vld [vmem:[#allocation7 + $0x588] sm:$0xff] }
 0x3b8   :  { %v425_v51 = vmax.f32 %v422_v49, 0.0  ;;  %v726_v49 = vld [vmem:[#allocation7 + $0x3e8] sm:$0xff] }
 0x3b9   :  { %v2013_v50 = vpack.c.bf16 %v726_v49, %v725_v48  ;;  %v902_v48 = vld [vmem:[#allocation7 + $0x4a8] sm:$0xff] }
 0x3ba   :  { %1579 = vmatmul.mubr.f32.vlgmr.msra.gmra.mrb[4].mxu0 %v425_v51  ;;  %v537_v51 = vsub.s32 5, %v2347_v11 }
 0x3bb   :  { %1648 = vmatprep.mubr.msk.f32.mxu0 %vm2250_vm0, %v2251_v1  ;;  %1972 = vmatpush3.bf16.msra.mxu0 %v1971_v58  ;;  %v611_v58 = vand.u32 127, %v75_v10 }
 0x3bc   :  { %1973 = vmatprep.subr.bf16.mxu0 %v2249_v0  ;;  %v538_v52 = vrot.slane %v2350_v13, %v537_v51  ;;  %v904_v51 = vld [vmem:[#allocation7 + $0x4b8] sm:$0xff] }
 0x3bd   :  { %vm617_vm1 = vcmp.ge.s32.totalorder %v611_v58, 2 }
 0x3bf   :  { %1975 = vmatpush3.bf16.msra.mxu0 %v1974_v60 }
 0x3c0   :  { %1976 = vmatprep.subr.bf16.mxu0 %v2249_v0 }
 0x3c3   :  { %1978 = vmatpush3.bf16.msra.mxu0 %v1977_v63 }
 0x3c4   :  { %1979 = vmatprep.subr.bf16.mxu0 %v2249_v0 }
 0x3c7   :  { %1981 = vmatpush3.bf16.msra.mxu0 %v1980_v14  ;;  %v809_v14 = vld [vmem:[#allocation7 + $0x420] sm:$0xff] }
 0x3c8   :  { %1982 = vmatprep.subr.bf16.mxu0 %v2249_v0  ;;  %v2025_v17 = vpack.c.bf16 %v810_v16, %v809_v14  ;;  %v991_v14 = vld [vmem:[#allocation7 + $0x510] sm:$0xff] }
 0x3cb   :  { %1984 = vmatpush3.bf16.msra.mxu0 %v1983_v18  ;;  %v811_v18 = vld [vmem:[#allocation7 + $0x430] sm:$0xff] }
 0x3cc   :  { %1985 = vmatprep.subr.bf16.mxu0 %v2249_v0  ;;  %v2028_v20 = vpack.c.bf16 %v812_v19, %v811_v18  ;;  %v993_v18 = vld [vmem:[#allocation7 + $0x520] sm:$0xff]  ;;  %v994_v19 = vld [vmem:[#allocation7 + $0x528] sm:$0xff] }
 0x3cf   :  { %1987 = vmatpush3.bf16.msra.mxu0 %v1986_v21  ;;  %v813_v21 = vld [vmem:[#allocation7 + $0x440] sm:$0xff] }
 0x3d0   :  { %1988 = vmatprep.subr.bf16.mxu0 %v2249_v0  ;;  %v2031_v23 = vpack.c.bf16 %v814_v22, %v813_v21  ;;  %v995_v21 = vld [vmem:[#allocation7 + $0x530] sm:$0xff]  ;;  %v996_v22 = vld [vmem:[#allocation7 + $0x538] sm:$0xff] }
 0x3d3   :  { %1990 = vmatpush3.bf16.msra.mxu0 %v1989_v24  ;;  %v815_v24 = vld [vmem:[#allocation7 + $0x450] sm:$0xff] }
 0x3d4   :  { %1991 = vmatprep.subr.bf16.mxu0 %v2249_v0  ;;  %v2034_v26 = vpack.c.bf16 %v816_v25, %v815_v24  ;;  %v997_v24 = vld [vmem:[#allocation7 + $0x540] sm:$0xff]  ;;  %v998_v25 = vld [vmem:[#allocation7 + $0x548] sm:$0xff] }
 0x3d7   :  { %1993 = vmatpush3.bf16.msra.mxu0 %v1992_v27  ;;  %v817_v27 = vld [vmem:[#allocation7 + $0x460] sm:$0xff] }
 0x3d8   :  { %2018 = vmatprep.subr.bf16.mxu0 %v2249_v0  ;;  %v2037_v29 = vpack.c.bf16 %v818_v28, %v817_v27  ;;  %v999_v27 = vld [vmem:[#allocation7 + $0x550] sm:$0xff]  ;;  %v1000_v28 = vld [vmem:[#allocation7 + $0x558] sm:$0xff] }
 0x48d   :  { %v513_v4 = vpop.f32.mrb[4].mxu0 }
 0x48e   :  { %v514_v5 = vadd.f32 %v513_v4, %v446_v3  ;;  %v1580_v6 = vpop.f32.mrb[5].mxu0  ;;  %v728_v3 = vld [vmem:[#allocation7 + $0x3f8] sm:$0xff] }
 0x48f   :  { %v2016_v4 = vpack.c.bf16 %v728_v3, %v727_v2  ;;  %v806_v6 = vld [vmem:[#allocation7 + $0x408] sm:$0xff] }
 0x490   :  { %v517_v7 = vmax.f32 %v514_v5, 0.0  ;;  %v805_v5 = vld [vmem:[#allocation7 + $0x400] sm:$0xff] }
 0x491   :  { %v2019_v10 = vpack.c.bf16 %v806_v6, %v805_v5  ;;  %v911_v6 = vld [vmem:[#allocation7 + $0x4f0] sm:$0xff] }
 0x492   :  { %1614 = vmatmul.mubr.f32.vlgmr.msra.gmra.mrb[4].mxu1 %v517_v7  ;;  %v807_v7 = vld [vmem:[#allocation7 + $0x410] sm:$0xff] }
 0x493   :  { %1683 = vmatprep.mubr.msk.f32.mxu1 %vm2250_vm0, %v2251_v1  ;;  %1996 = vmatpush3.bf16.msra.mxu1 %v1995_v31  ;;  %v2022_v9 = vpack.c.bf16 %v808_v8, %v807_v7  ;;  %v640_v31 = vrot.slane %v2350_v13, %v639_v30  ;;  %v912_v7 = vld [vmem:[#allocation7 + $0x4f8] sm:$0xff]  ;;  %v989_v8 = vld [vmem:[#allocation7 + $0x500] sm:$0xff] }
 0x494   :  { %1997 = vmatprep.subr.bf16.mxu1 %v2249_v0  ;;  %v1001_v30 = vld [vmem:[#allocation7 + $0x560] sm:$0xff] }
 0x497   :  { %1999 = vmatpush3.bf16.msra.mxu1 %v1998_v33 }
 0x498   :  { %2000 = vmatprep.subr.bf16.mxu1 %v2249_v0 }
 0x49b   :  { %2002 = vmatpush3.bf16.msra.mxu1 %v2001_v36  ;;  %v819_v36 = vld [vmem:[#allocation7 + $0x470] sm:$0xff] }
 0x49c   :  { %2003 = vmatprep.subr.bf16.mxu1 %v2249_v0  ;;  %v2040_v38 = vpack.c.bf16 %v820_v37, %v819_v36 }
 0x49f   :  { %2005 = vmatpush3.bf16.msra.mxu1 %v2004_v39  ;;  %v897_v39 = vld [vmem:[#allocation7 + $0x480] sm:$0xff] }
 0x4a0   :  { %2006 = vmatprep.subr.bf16.mxu1 %v2249_v0 }
 0x4a3   :  { %2008 = vmatpush3.bf16.msra.mxu1 %v2007_v42  ;;  %v2043_v42 = vpack.c.bf16 %v898_v40, %v897_v39  ;;  %v1003_v39 = vld [vmem:[#allocation7 + $0x570] sm:$0xff]  ;;  %v1004_v40 = vld [vmem:[#allocation7 + $0x578] sm:$0xff] }
 0x4a4   :  { %2009 = vmatprep.subr.bf16.mxu1 %v2249_v0  ;;  %v2088_v41 = vpack.c.bf16 %v1004_v40, %v1003_v39 }
 0x4a7   :  { %2011 = vmatpush3.bf16.msra.mxu1 %v2010_v47  ;;  %v901_v47 = vld [vmem:[#allocation7 + $0x4a0] sm:$0xff] }
 0x4a8   :  { %2012 = vmatprep.subr.bf16.mxu1 %v2249_v0  ;;  %v2049_v49 = vpack.c.bf16 %v902_v48, %v901_v47  ;;  %v1084_v48 = vld [vmem:[#allocation7 + $0x598] sm:$0xff] }
 0x4ab   :  { %2014 = vmatpush3.bf16.msra.mxu1 %v2013_v50  ;;  %v903_v50 = vld [vmem:[#allocation7 + $0x4b0] sm:$0xff] }
 0x4ac   :  { %2015 = vmatprep.subr.bf16.mxu1 %v2249_v0 }
 0x4af   :  { %2017 = vmatpush3.bf16.msra.mxu1 %v2016_v4 }
 0x4b0   :  { %2042 = vmatprep.subr.bf16.mxu1 %v2249_v0 }
 0x565   :  { %v605_v53 = vpop.f32.mrb[4].mxu1 }
 0x566   :  { %v606_v54 = vadd.f32 %v605_v53, %v538_v52  ;;  %v1615_v55 = vpop.f32.mrb[5].mxu1  ;;  %v2052_v52 = vpack.c.bf16 %v904_v51, %v903_v50  ;;  %v905_v53 = vld [vmem:[#allocation7 + $0x4c0] sm:$0xff]  ;;  %v1086_v50 = vld [vmem:[#allocation7 + $0x5a8] sm:$0xff] }
 0x568   :  { %v613_v56 = vmul.f32 0.5, %v606_v54  ;;  %609 = vst [vmem:[#allocation8] sm:$0xff] %v606_v54  ;;  %v618_v62 = vsel %vm617_vm1, %v606_v54, 0.0  ;;  %v906_v54 = vld [vmem:[#allocation7 + $0x4c8] sm:$0xff] }
 0x569   :  { %v2055_v55 = vpack.c.bf16 %v906_v54, %v905_v53  ;;  %v1089_v54 = vld [vmem:[#allocation7 + $0x5c0] sm:$0xff] }
 0x56a   :  { %v614_v57 = vmul.f32 1.442695, %v613_v56  ;;  %v907_v56 = vld [vmem:[#allocation7 + $0x4d0] sm:$0xff] }
 0x56c   :  { %2124 = vpow2.f32 %v614_v57  ;;  %v908_v57 = vld [vmem:[#allocation7 + $0x4d8] sm:$0xff] }
 0x56d   :  { %v2058_v58 = vpack.c.bf16 %v908_v57, %v907_v56  ;;  %v1091_v57 = vld [vmem:[#allocation7 + $0x5d0] sm:$0xff] }
 0x576   :  { %v2125_v60 = vpop.eup %2124 }
 0x577   :  { %v616_v61 = vmul.f32 %v2125_v60, %v612_v59  ;;  %v909_v59 = vld [vmem:[#allocation7 + $0x4e0] sm:$0xff]  ;;  %v910_v60 = vld [vmem:[#allocation7 + $0x4e8] sm:$0xff] }
 0x579   :  { %v619_v63 = vadd.f32 %v618_v62, %v616_v61  ;;  %v2061_v61 = vpack.c.bf16 %v910_v60, %v909_v59  ;;  %v731_v62 = vsub.s32 7, %v2347_v11  ;;  %v1093_v60 = vld [vmem:[#allocation7 + $0x5e0] sm:$0xff] }
 0x57b   :  { %1649 = vmatmul.mubr.f32.vlgmr.msra.gmra.mrb[6].mxu0 %v619_v63  ;;  %v732_v63 = vrot.slane %v2350_v13, %v731_v62 }
 0x57c   :  { %1718 = vmatprep.mubr.msk.f32.mxu0 %vm2250_vm0, %v2251_v1  ;;  %2020 = vmatpush3.bf16.msra.mxu0 %v2019_v10  ;;  %v2064_v10 = vpack.c.bf16 %v912_v7, %v911_v6  ;;  %v1095_v6 = vld [vmem:[#allocation7 + $0x5f0] sm:$0xff]  ;;  %v1096_v7 = vld [vmem:[#allocation7 + $0x5f8] sm:$0xff] }
 0x57d   :  { %2021 = vmatprep.subr.bf16.mxu0 %v2249_v0 }
 0x580   :  { %2023 = vmatpush3.bf16.msra.mxu0 %v2022_v9  ;;  %v990_v9 = vld [vmem:[#allocation7 + $0x508] sm:$0xff] }
 0x581   :  { %2024 = vmatprep.subr.bf16.mxu0 %v2249_v0  ;;  %v2067_v16 = vpack.c.bf16 %v990_v9, %v989_v8 }
 0x584   :  { %2026 = vmatpush3.bf16.msra.mxu0 %v2025_v17  ;;  %v992_v17 = vld [vmem:[#allocation7 + $0x518] sm:$0xff] }
 0x585   :  { %2027 = vmatprep.subr.bf16.mxu0 %v2249_v0  ;;  %v2070_v13 = vpack.c.bf16 %v992_v17, %v991_v14 }
 0x588   :  { %2029 = vmatpush3.bf16.msra.mxu0 %v2028_v20  ;;  %v2073_v20 = vpack.c.bf16 %v994_v19, %v993_v18 }
 0x589   :  { %2030 = vmatprep.subr.bf16.mxu0 %v2249_v0 }
 0x58c   :  { %2032 = vmatpush3.bf16.msra.mxu0 %v2031_v23  ;;  %v2076_v23 = vpack.c.bf16 %v996_v22, %v995_v21 }
 0x58d   :  { %2033 = vmatprep.subr.bf16.mxu0 %v2249_v0 }
 0x590   :  { %2035 = vmatpush3.bf16.msra.mxu0 %v2034_v26  ;;  %v2079_v26 = vpack.c.bf16 %v998_v25, %v997_v24 }
 0x591   :  { %2036 = vmatprep.subr.bf16.mxu0 %v2249_v0 }
 0x594   :  { %2038 = vmatpush3.bf16.msra.mxu0 %v2037_v29  ;;  %v2082_v29 = vpack.c.bf16 %v1000_v28, %v999_v27 }
 0x595   :  { %2039 = vmatprep.subr.bf16.mxu0 %v2249_v0 }
 0x598   :  { %2041 = vmatpush3.bf16.msra.mxu0 %v2040_v38 }
 0x599   :  { %2066 = vmatprep.subr.bf16.mxu0 %v2249_v0 }
 0x64e   :  { %v707_v32 = vpop.f32.mrb[6].mxu0 }
 0x64f   :  { %v708_v33 = vadd.f32 %v707_v32, %v640_v31  ;;  %v1650_v34 = vpop.f32.mrb[7].mxu0  ;;  %v1002_v31 = vld [vmem:[#allocation7 + $0x568] sm:$0xff] }
 0x650   :  { %v2085_v32 = vpack.c.bf16 %v1002_v31, %v1001_v30 }
 0x651   :  { %v711_v35 = vmax.f32 %v708_v33, 0.0  ;;  %v2456_v33 = vld [vmem:[#allocation7 + $0x608] sm:$0xff] }
 0x652   :  { %v824_v34 = vrot.slane %v2456_v33, %v77_v12  ;;  %v1085_v12 = vld [vmem:[#allocation7 + $0x5a0] sm:$0xff]  ;;  %v1008_v8 = vrot.slane %v2456_v33, %v261_v15 }
 0x653   :  { %1684 = vmatmul.mubr.f32.vlgmr.msra.gmra.mrb[6].mxu1 %v711_v35  ;;  %v2097_v51 = vpack.c.bf16 %v1086_v50, %v1085_v12 }
 0x654   :  { %1753 = vmatprep.mubr.msk.f32.mxu1 %vm2250_vm0, %v2251_v1  ;;  %2044 = vmatpush3.bf16.msra.mxu1 %v2043_v42  ;;  %v1081_v42 = vld [vmem:[#allocation7 + $0x580] sm:$0xff] }
 0x655   :  { %2045 = vmatprep.subr.bf16.mxu1 %v2249_v0  ;;  %v2091_v47 = vpack.c.bf16 %v1082_v44, %v1081_v42 }
 0x658   :  { %2047 = vmatpush3.bf16.msra.mxu1 %v2046_v45  ;;  %v1083_v45 = vld [vmem:[#allocation7 + $0x590] sm:$0xff] }
 0x659   :  { %2048 = vmatprep.subr.bf16.mxu1 %v2249_v0 }
 0x65c   :  { %2050 = vmatpush3.bf16.msra.mxu1 %v2049_v49  ;;  %v2094_v49 = vpack.c.bf16 %v1084_v48, %v1083_v45 }
 0x65d   :  { %2051 = vmatprep.subr.bf16.mxu1 %v2249_v0 }
 0x660   :  { %2053 = vmatpush3.bf16.msra.mxu1 %v2052_v52  ;;  %v1088_v52 = vld [vmem:[#allocation7 + $0x5b8] sm:$0xff] }
 0x661   :  { %2054 = vmatprep.subr.bf16.mxu1 %v2249_v0 }
 0x664   :  { %2056 = vmatpush3.bf16.msra.mxu1 %v2055_v55  ;;  %v1090_v55 = vld [vmem:[#allocation7 + $0x5c8] sm:$0xff] }
 0x665   :  { %2057 = vmatprep.subr.bf16.mxu1 %v2249_v0  ;;  %v2103_v56 = vpack.c.bf16 %v1090_v55, %v1089_v54 }
 0x668   :  { %2059 = vmatpush3.bf16.msra.mxu1 %v2058_v58  ;;  %v1092_v58 = vld [vmem:[#allocation7 + $0x5d8] sm:$0xff] }
 0x669   :  { %2060 = vmatprep.subr.bf16.mxu1 %v2249_v0  ;;  %v2106_v59 = vpack.c.bf16 %v1092_v58, %v1091_v57 }
 0x66c   :  { %2062 = vmatpush3.bf16.msra.mxu1 %v2061_v61  ;;  %v1094_v61 = vld [vmem:[#allocation7 + $0x5e8] sm:$0xff] }
 0x66d   :  { %2063 = vmatprep.subr.bf16.mxu1 %v2249_v0  ;;  %v2109_v62 = vpack.c.bf16 %v1094_v61, %v1093_v60 }
 0x670   :  { %2065 = vmatpush3.bf16.msra.mxu1 %v2064_v10  ;;  %v2112_v10 = vpack.c.bf16 %v1096_v7, %v1095_v6 }
 0x671   :  { %2090 = vmatprep.subr.bf16.mxu1 %v2249_v0 }
 0x726   :  { %v799_v2 = vpop.f32.mrb[6].mxu1 }
 0x727   :  { %v800_v3 = vadd.f32 %v799_v2, %v732_v63  ;;  %v1685_v4 = vpop.f32.mrb[7].mxu1  ;;  %v916_v63 = vrot.slane %v2456_v33, %v169_v43 }
 0x729   :  { %v803_v5 = vmax.f32 %v800_v3, 0.0 }
 0x72b   :  { %1719 = vmatmul.mubr.f32.vlgmr.msra.gmra.mrb[8].mxu0 %v803_v5 }
 0x72c   :  { %1788 = vmatprep.mubr.msk.f32.mxu0 %vm2250_vm0, %v2251_v1  ;;  %2068 = vmatpush3.bf16.msra.mxu0 %v2067_v16 }
 0x72d   :  { %2069 = vmatprep.subr.bf16.mxu0 %v2249_v0 }
 0x730   :  { %2071 = vmatpush3.bf16.msra.mxu0 %v2070_v13 }
 0x731   :  { %2072 = vmatprep.subr.bf16.mxu0 %v2249_v0 }
 0x734   :  { %2074 = vmatpush3.bf16.msra.mxu0 %v2073_v20 }
 0x735   :  { %2075 = vmatprep.subr.bf16.mxu0 %v2249_v0 }
 0x738   :  { %2077 = vmatpush3.bf16.msra.mxu0 %v2076_v23 }
 0x739   :  { %2078 = vmatprep.subr.bf16.mxu0 %v2249_v0 }
 0x73c   :  { %2080 = vmatpush3.bf16.msra.mxu0 %v2079_v26 }
 0x73d   :  { %2081 = vmatprep.subr.bf16.mxu0 %v2249_v0 }
 0x740   :  { %2083 = vmatpush3.bf16.msra.mxu0 %v2082_v29 }
 0x741   :  { %2084 = vmatprep.subr.bf16.mxu0 %v2249_v0 }
 0x744   :  { %2086 = vmatpush3.bf16.msra.mxu0 %v2085_v32 }
 0x745   :  { %2087 = vmatprep.subr.bf16.mxu0 %v2249_v0 }
 0x748   :  { %2089 = vmatpush3.bf16.msra.mxu0 %v2088_v41 }
 0x7fe   :  { %v891_v35 = vpop.f32.mrb[8].mxu0 }
 0x7ff   :  { %v892_v36 = vadd.f32 %v891_v35, %v824_v34  ;;  %v1720_v37 = vpop.f32.mrb[9].mxu0 }
 0x801   :  { %v895_v38 = vmax.f32 %v892_v36, 0.0 }
 0x803   :  { %1754 = vmatmul.mubr.f32.vlgmr.msra.gmra.mrb[8].mxu1 %v895_v38 }
 0x804   :  { %1823 = vmatprep.mubr.msk.f32.mxu1 %vm2250_vm0, %v2251_v1  ;;  %2092 = vmatpush3.bf16.msra.mxu1 %v2091_v47  ;;  %v1087_v1 = vld [vmem:[#allocation7 + $0x5b0] sm:$0xff] }
 0x805   :  { %2093 = vmatprep.subr.bf16.mxu1 %v2249_v0  ;;  %v2100_v53 = vpack.c.bf16 %v1088_v52, %v1087_v1 }
 0x808   :  { %2095 = vmatpush3.bf16.msra.mxu1 %v2094_v49 }
 0x809   :  { %2096 = vmatprep.subr.bf16.mxu1 %v2249_v0 }
 0x80c   :  { %2098 = vmatpush3.bf16.msra.mxu1 %v2097_v51 }
 0x80d   :  { %2099 = vmatprep.subr.bf16.mxu1 %v2249_v0 }
 0x810   :  { %2101 = vmatpush3.bf16.msra.mxu1 %v2100_v53 }
 0x811   :  { %2102 = vmatprep.subr.bf16.mxu1 %v2249_v0 }
 0x814   :  { %2104 = vmatpush3.bf16.msra.mxu1 %v2103_v56 }
 0x815   :  { %2105 = vmatprep.subr.bf16.mxu1 %v2249_v0 }
 0x818   :  { %2107 = vmatpush3.bf16.msra.mxu1 %v2106_v59 }
 0x819   :  { %2108 = vmatprep.subr.bf16.mxu1 %v2249_v0 }
 0x81c   :  { %2110 = vmatpush3.bf16.msra.mxu1 %v2109_v62 }
 0x81d   :  { %2111 = vmatprep.subr.bf16.mxu1 %v2249_v0 }
 0x820   :  { %2113 = vmatpush3.bf16.msra.mxu1 %v2112_v10 }
 0x8d6   :  { %v983_v2 = vpop.f32.mrb[8].mxu1 }
 0x8d7   :  { %v984_v3 = vadd.f32 %v983_v2, %v916_v63  ;;  %v1755_v4 = vpop.f32.mrb[9].mxu1 }
 0x8d9   :  { %v987_v5 = vmax.f32 %v984_v3, 0.0 }
 0x8db   :  { %1789 = vmatmul.mubr.f32.vlgmr.msra.gmra.mrb[10].mxu0 %v987_v5 }
 0x9ae   :  { %v1075_v9 = vpop.f32.mrb[10].mxu0 }
 0x9af   :  { %v1076_v14 = vadd.f32 %v1075_v9, %v1008_v8  ;;  %v1790_v0 = vpop.f32.mrb[11].mxu0 }
 0x9b1   :  { %v1079_v16 = vmax.f32 %v1076_v14, 0.0 }
 0x9b3   :  { %1824 = vmatmul.mubr.f32.vlgmr.msra.gmra.mrb[10].mxu1 %v1079_v16 }
 0x9b4   :  { %2203 = shalt.err (!%p2200_p0)
}
 0x9b5   :  { %s2204_s29 = scalar_lea.hbm %s2506_s3, 128 }
 0x9b6   :  { %p2205_p1 = scmp.ne.s32.totalorder %s2506_s3, %s2204_s29  ;;  %p2208_p2 = scmp.lt.u32.totalorder %s2204_s29, %s2506_s3 }
 0x9b8   :  { %p2210_p3 = pnand %p2208_p2, %p2205_p1 }
 0x9ba   :  { %2213 = shalt.err (!%p2210_p3)
}
 0x9bb   :  { %1181 = dma.vmem_to_hbm [thread:$0]  %s1179_s25, 128, %s2506_s3, [#allocation4]   ;;  %v1100_v43 = vrot.slane %v2456_v33, %v353_v46 }
 0x9bc   :  { %s2253_s10 = smov [#allocation9]  }
 0x9bd   :  { %s1188_s1 = sshll.u32 %s2253_s10, 4  ;;  %s1189_s1 = int_to_ptr.vmem [resolvable:$true] %s1188_s1 }
 0x9be   :  { %s2214_s11 = scalar_lea.vmem %s1189_s1, 128  ;;  %p2219_p5 = scmp.lt.s32.totalorder %s1189_s1, %s1189_s1 }
 0x9bf   :  { %p2215_p4 = scmp.ne.s32.totalorder %s1189_s1, %s2214_s11  ;;  %p2220_p6 = scmp.lt.s32.totalorder %s2214_s11, %s2214_s11 }
 0x9c1   :  { %p2221_p7 = por %p2220_p6, %p2219_p5 }
 0x9c3   :  { %p2222_p8 = pnand %p2221_p7, %p2215_p4 }
 0xa86   :  { %v1167_v15 = vpop.f32.mrb[10].mxu1 }
 0xa87   :  { %v1168_v17 = vadd.f32 %v1167_v15, %v1100_v43  ;;  %v1825_v13 = vpop.f32.mrb[11].mxu1 }
 0xa89   :  { %1171 = vst [vmem:[#allocation9] sm:$0xff] %v1168_v17 }
 0xa8a   :  { %2225 = shalt.err (!%p2222_p8)
}
 0xa8b   :  { %s2226_s13 = scalar_lea.hbm %s2507_s4, 128 }
 0xa8c   :  { %p2227_p9 = scmp.ne.s32.totalorder %s2507_s4, %s2226_s13  ;;  %p2230_p10 = scmp.lt.u32.totalorder %s2226_s13, %s2507_s4 }
 0xa8e   :  { %p2232_p11 = pnand %p2230_p10, %p2227_p9 }
 0xa90   :  { %2235 = shalt.err (!%p2232_p11)
}
 0xa91   :  { %1191 = dma.vmem_to_hbm [thread:$0]  %s1189_s1, 128, %s2507_s4, [#allocation10]  }
 0xa92   :  { %2240 = dma.done.wait [#allocation4], 128  }
 0xa93   :  { %2241 = vsyncadd [#allocation4], 4294967168 }
 0xa94   :  { %2242 = dma.done.wait [#allocation10], 128  }
 0xa95   :  { %2243 = vsyncadd [#allocation10], 4294967168 }
 0xa96   :  { %1198 = vsyncpa [#allocation3], 1 }
 0xa97   :  { %1199 = vsyncpa [#allocation6], 1 }
 0xa98   :  { %1200 = vsyncpa [#allocation4], 1 }
 0xa99   :  { %1201 = vsyncpa [#allocation10], 1 }

</bundles_post_ra>
